<compile_context>
chip_gen: v7x
topology: tpu7x:2x2x1
jax: 0.10.0
libtpu: 0.0.40
codegen_flags: <defaults>
</compile_context>

<pallas_src>
import jax
import jax.numpy as jnp
from jax import lax
from jax.experimental import pallas as pl
from jax.experimental.pallas import tpu as pltpu

# Matmul operand dtype (accumulation stays f32). Set to jnp.float32 for bit-tight testing.
MXU_DTYPE = jnp.bfloat16


# ----------------------------------------------------------------------------- kernel

def fused_ag_up_block_kernel(b_ref, s_ref,
                             wup_ref, bup_ref,
                             wg_ref, bg_ref, wx_ref, pbd_ref, bpsi_ref,
                             w1s_ref, w1b_ref, sc1_ref, sh1_ref,
                             w2_ref, sc2_ref, sh2_ref,
                             o_ref,
                             g_pad, b_pad, y_pad):
    """Fused upconv -> attention gate -> concat -> (conv3x3+BN+ReLU)x2 for one batch element.

    Lane-dense layout everywhere: 2-D tensors of shape (image_rows, width*channels).

    b_ref : (1, Hb, Wb*Cb)   low-res gating input
    s_ref : (1, H,  W*Cs)    concatenated skip
    o_ref : (1, H,  W*nr)    output block (lane dense)
    g_pad : (H+2, (W+2)*Cs)  padded gated-skip scratch   (conv1 input, part 1)
    b_pad : (H+2, (W+2)*nr)  padded upsampled-b scratch  (conv1 input, part 2)
    y_pad : (H+2, (W+2)*nr)  padded conv1-output scratch (conv2 input)
    """
    f32 = jnp.float32
    H = g_pad.shape[0] - 2
    WNr = o_ref.shape[-1]                     # W * nr
    WCs = s_ref.shape[-1]                     # W * Cs
    Cs = (g_pad.shape[1] - WCs) // 2
    nr = (b_pad.shape[1] - WNr) // 2
    pdt = g_pad.dtype

    # ---- ConvTranspose2d(k=2, s=2): two row-parity block-diagonal matmuls, rows interleaved
    #      in registers (merge-leading-dims reshape, minor dim unchanged).
    b2d = b_ref[0].astype(MXU_DTYPE)                                           # (Hb, Wb*Cb)
    y0 = jnp.dot(b2d, wup_ref[0], preferred_element_type=f32) + bup_ref[...]   # rows 2h+0
    y1 = jnp.dot(b2d, wup_ref[1], preferred_element_type=f32) + bup_ref[...]   # rows 2h+1
    bu = jnp.stack([y0, y1], axis=1).reshape(H, WNr)                           # (H, W*nr) f32

    # ---- additive attention gate: 1x1 convs as block-diagonal matmuls (no relayouts) ----
    s2d = s_ref[0]                                                             # (H, W*Cs) f32
    g1 = jnp.dot(bu.astype(MXU_DTYPE), wg_ref[...], preferred_element_type=f32) + bg_ref[...]
    x1 = jnp.dot(s2d.astype(MXU_DTYPE), wx_ref[...], preferred_element_type=f32)
    f = jnp.maximum(g1 + x1, 0.0)                                              # (H, W*nr)
    # psi: per-pixel reduce over nr channels and broadcast to the skip's Cs lanes in one
    # f32 matmul (kept f32 so the gate value matches the f32 reference closely).
    psi = jnp.dot(f, pbd_ref[...], preferred_element_type=f32) + bpsi_ref[...]  # (H, W*Cs)
    gated = s2d * jax.nn.sigmoid(psi)                                          # (H, W*Cs)

    # ---- write conv inputs into the padded scratches.  Left/right halo columns are folded
    #      into a single lane-aligned store via an in-register concat; top/bottom halo rows
    #      are re-zeroed each step (tiny in this 2-D layout, and safe under megacore). ----
    zrow_g = jnp.zeros((1, g_pad.shape[1]), pdt)
    zrow_n = jnp.zeros((1, b_pad.shape[1]), pdt)
    zc = jnp.zeros((H, Cs), pdt)
    zn = jnp.zeros((H, nr), pdt)
    g_pad[0:1, :] = zrow_g
    g_pad[H + 1:H + 2, :] = zrow_g
    b_pad[0:1, :] = zrow_n
    b_pad[H + 1:H + 2, :] = zrow_n
    y_pad[0:1, :] = zrow_n
    y_pad[H + 1:H + 2, :] = zrow_n
    g_pad[1:H + 1, :] = jnp.concatenate([zc, gated.astype(pdt), zc], axis=1)
    b_pad[1:H + 1, :] = jnp.concatenate([zn, bu.astype(pdt), zn], axis=1)

    # ---- conv1 3x3 + folded BN + ReLU: 3 row-tap Toeplitz matmuls per input part
    #      (conv1(concat([gated, bu])) == conv1_s(gated) + conv1_b(bu) by linearity). ----
    acc = jnp.zeros((H, WNr), f32)
    for di in range(3):
        acc = acc + jnp.dot(g_pad[di:di + H, :], w1s_ref[di], preferred_element_type=f32)
        acc = acc + jnp.dot(b_pad[di:di + H, :], w1b_ref[di], preferred_element_type=f32)
    yc1 = jnp.maximum(acc * sc1_ref[...] + sh1_ref[...], 0.0)                  # (H, W*nr)
    y_pad[1:H + 1, :] = jnp.concatenate([zn, yc1.astype(pdt), zn], axis=1)

    # ---- conv2 3x3 + folded BN + ReLU ----
    acc2 = jnp.zeros((H, WNr), f32)
    for di in range(3):
        acc2 = acc2 + jnp.dot(y_pad[di:di + H, :], w2_ref[di], preferred_element_type=f32)
    yc2 = jnp.maximum(acc2 * sc2_ref[...] + sh2_ref[...], 0.0)
    o_ref[0] = yc2.astype(o_ref.dtype)                                         # lane-dense store


# ----------------------------------------------------------------------------- weight packing

def _block_diag(block, reps):
    """kron(I_reps, block): per-pixel channel matmul in the (rows, width*channels) layout."""
    return jnp.kron(jnp.eye(reps, dtype=block.dtype), block)


def _conv_row_toeplitz(wconv, width):
    """Conv weight (Cout, Cin, 3, 3) -> 3 row-tap Toeplitz matrices (3, (W+2)*Cin, W*Cout).

    On a zero-padded lane-dense buffer pad[(H+2), (W+2)*Cin]:
      conv_out[h, wo*Cout + o] = sum_di  pad[h + di, :] @ T[di]
    reproduces a 'same' 3x3 convolution.
    """
    cout, cin = wconv.shape[0], wconv.shape[1]
    mats = []
    for di in range(3):
        t = jnp.zeros(((width + 2) * cin, width * cout), jnp.float32)
        for dj in range(3):
            sel = jnp.eye(width + 2, width, k=-dj, dtype=jnp.float32)   # wi == wo + dj
            t = t + jnp.kron(sel, wconv[:, :, di, dj].T.astype(jnp.float32))
        mats.append(t)
    return jnp.stack(mats, axis=0)


# ----------------------------------------------------------------------------- forward (wrapper)

def attention_gate_up_block(b_nchw, s_list_nchw, p, eps=1e-5):
    nr = p['nr_channels']
    s_nchw = jnp.concatenate(s_list_nchw, axis=1)
    b_nhwc = jnp.transpose(b_nchw, (0, 2, 3, 1))
    s_nhwc = jnp.transpose(s_nchw, (0, 2, 3, 1))
    n, hb, wb, cb = b_nhwc.shape
    cs = s_nhwc.shape[-1]
    h, w = 2 * hb, 2 * wb
    assert (h, w) == (s_nhwc.shape[1], s_nhwc.shape[2])

    # Lane-dense (rows, width*channels) views -- free row-major reshapes of NHWC.
    b2d = b_nhwc.reshape(n, hb, wb * cb)
    s2d = s_nhwc.reshape(n, h, w * cs)

    # --- ConvTranspose2d(k=2,s=2) as two row-parity block-diagonal matmuls.
    # up_w: (Cb, nr, 2, 2);  block_p[c, q*nr + o] = up_w[c, o, p, q]
    blocks = [jnp.transpose(p['up_w'][:, :, pp, :], (0, 2, 1)).reshape(cb, 2 * nr)
              for pp in range(2)]
    wup = jnp.stack([_block_diag(blk.astype(jnp.float32), wb) for blk in blocks],
                    axis=0).astype(MXU_DTYPE)                              # (2, Wb*Cb, W*nr)
    bup = jnp.tile(p['up_b'], w).reshape(1, w * nr).astype(jnp.float32)

    # --- attention-gate 1x1 convs as block-diagonal matmuls in the lane-dense layout.
    wg_bd = _block_diag(p['ag_wg'][:, :, 0, 0].T.astype(jnp.float32), w).astype(MXU_DTYPE)
    bg_row = jnp.tile(p['ag_wg_b'], w).reshape(1, w * nr).astype(jnp.float32)
    wx_bd = _block_diag(p['ag_wx'][:, :, 0, 0].T.astype(jnp.float32), w).astype(MXU_DTYPE)
    # psi: reduce over nr channels and broadcast to Cs lanes in one matmul (kept f32).
    psi_blk = jnp.broadcast_to(p['ag_psi_w'][0, :, 0, 0][:, None], (nr, cs)).astype(jnp.float32)
    p_bd = _block_diag(psi_blk, w)                                          # (W*nr, W*Cs) f32
    bpsi = p['ag_psi_b'].reshape(1, 1).astype(jnp.float32)

    # --- conv3x3 + BN folding; conv1 split into gated-part / bu-part (no in-kernel concat).
    def fold_bn(bias, gamma, beta, mean, var):
        scale = gamma / jnp.sqrt(var + eps)
        shift = beta - mean * scale + bias * scale
        return (jnp.tile(scale, w).reshape(1, w * nr).astype(jnp.float32),
                jnp.tile(shift, w).reshape(1, w * nr).astype(jnp.float32))

    w1s = _conv_row_toeplitz(p['c1_w'][:, :cs], w).astype(MXU_DTYPE)        # (3, (W+2)*Cs, W*nr)
    w1b = _conv_row_toeplitz(p['c1_w'][:, cs:], w).astype(MXU_DTYPE)        # (3, (W+2)*nr, W*nr)
    sc1, sh1 = fold_bn(p['c1_b'], p['bn1_gamma'], p['bn1_beta'], p['bn1_mean'], p['bn1_var'])
    w2t = _conv_row_toeplitz(p['c2_w'], w).astype(MXU_DTYPE)                # (3, (W+2)*nr, W*nr)
    sc2, sh2 = fold_bn(p['c2_b'], p['bn2_gamma'], p['bn2_beta'], p['bn2_mean'], p['bn2_var'])

    def full(shape):
        return pl.BlockSpec(shape, lambda i, _n=len(shape): (0,) * _n)

    out2d = pl.pallas_call(
        fused_ag_up_block_kernel,
        out_shape=jax.ShapeDtypeStruct((n, h, w * nr), jnp.float32),
        grid_spec=pltpu.PrefetchScalarGridSpec(
            num_scalar_prefetch=0, grid=(n,),
            in_specs=[pl.BlockSpec((1, hb, wb * cb), lambda i: (i, 0, 0)),   # b
                      pl.BlockSpec((1, h, w * cs), lambda i: (i, 0, 0)),     # s
                      full((2, wb * cb, w * nr)),          # wup
                      full((1, w * nr)),                   # bup
                      full((w * nr, w * nr)),              # wg_bd
                      full((1, w * nr)),                   # bg_row
                      full((w * cs, w * nr)),              # wx_bd
                      full((w * nr, w * cs)),              # p_bd
                      full((1, 1)),                        # bpsi
                      full((3, (w + 2) * cs, w * nr)),     # w1s
                      full((3, (w + 2) * nr, w * nr)),     # w1b
                      full((1, w * nr)),                   # sc1
                      full((1, w * nr)),                   # sh1
                      full((3, (w + 2) * nr, w * nr)),     # w2
                      full((1, w * nr)),                   # sc2
                      full((1, w * nr))],                  # sh2
            out_specs=pl.BlockSpec((1, h, w * nr), lambda i: (i, 0, 0)),
            scratch_shapes=[pltpu.VMEM((h + 2, (w + 2) * cs), MXU_DTYPE),
                            pltpu.VMEM((h + 2, (w + 2) * nr), MXU_DTYPE),
                            pltpu.VMEM((h + 2, (w + 2) * nr), MXU_DTYPE)]),
        compiler_params=pltpu.CompilerParams(dimension_semantics=("parallel",)),
    )(b2d, s2d, wup, bup, wg_bd, bg_row, wx_bd, p_bd, bpsi,
      w1s, w1b, sc1, sh1, w2t, sc2, sh2)

    out = out2d.reshape(n, h, w, nr)            # free reshape from the lane-dense layout
    return jnp.transpose(out, (0, 3, 1, 2))     # back to NCHW


# ----------------------------------------------------------------------------- pure-JAX reference

def reference_forward(b, s_list, p, eps=1e-5):
    nr = p['nr_channels']
    s = jnp.concatenate(s_list, axis=1)
    n, cb, hb, wb = b.shape
    # ConvTranspose2d(k=2, s=2)
    t = jnp.einsum('nchw,copq->nohpwq', b, p['up_w'])
    bu = t.reshape(n, nr, 2 * hb, 2 * wb) + p['up_b'][None, :, None, None]
    # attention gate
    g1 = jnp.einsum('nchw,oc->nohw', bu, p['ag_wg'][:, :, 0, 0]) + p['ag_wg_b'][None, :, None, None]
    x1 = jnp.einsum('nchw,oc->nohw', s, p['ag_wx'][:, :, 0, 0])
    f = jax.nn.relu(g1 + x1)
    psi = jax.nn.sigmoid(jnp.einsum('nchw,oc->nohw', f, p['ag_psi_w'][:, :, 0, 0])
                         + p['ag_psi_b'][None, :, None, None])
    gated = s * psi
    x = jnp.concatenate([gated, bu], axis=1)

    def cbr(x, wgt, bias, gamma, beta, mean, var):
        y = lax.conv_general_dilated(x, wgt, (1, 1), ((1, 1), (1, 1)),
                                     dimension_numbers=('NCHW', 'OIHW', 'NCHW'))
        y = y + bias[None, :, None, None]
        y = ((y - mean[None, :, None, None]) / jnp.sqrt(var[None, :, None, None] + eps)
             * gamma[None, :, None, None] + beta[None, :, None, None])
        return jax.nn.relu(y)

    x = cbr(x, p['c1_w'], p['c1_b'], p['bn1_gamma'], p['bn1_beta'], p['bn1_mean'], p['bn1_var'])
    x = cbr(x, p['c2_w'], p['c2_b'], p['bn2_gamma'], p['bn2_beta'], p['bn2_mean'], p['bn2_var'])
    return x


# ----------------------------------------------------------------------------- main

if __name__ == "__main__":
    key = jax.random.PRNGKey(0)
    keys = jax.random.split(key, 24)

    N, nr = 2, 8
    Cb, Hb, Wb = 16, 8, 8            # b: one level below (half spatial resolution)
    Cs_each, n_skips = 4, 2          # skip list (UNet++ style: two skips at this level)
    Cs = Cs_each * n_skips
    Cin_layer = Cs + nr              # input channels to the first 3x3 conv

    b = jax.random.normal(keys[0], (N, Cb, Hb, Wb), jnp.float32)
    s_list = [jax.random.normal(keys[1 + i], (N, Cs_each, 2 * Hb, 2 * Wb), jnp.float32)
              for i in range(n_skips)]

    params = {
        'nr_channels': nr,
        # ConvTranspose2d(Cb -> nr, k=2, s=2): weight (Cin, Cout, 2, 2)
        'up_w': 0.1 * jax.random.normal(keys[4], (Cb, nr, 2, 2), jnp.float32),
        'up_b': 0.1 * jax.random.normal(keys[5], (nr,), jnp.float32),
        # attention gate: W_g (nr->nr, bias), W_x (Cs->nr, no bias), psi (nr->1, bias)
        'ag_wg': 0.2 * jax.random.normal(keys[6], (nr, nr, 1, 1), jnp.float32),
        'ag_wg_b': 0.1 * jax.random.normal(keys[7], (nr,), jnp.float32),
        'ag_wx': 0.2 * jax.random.normal(keys[8], (nr, Cs, 1, 1), jnp.float32),
        'ag_psi_w': 0.2 * jax.random.normal(keys[9], (1, nr, 1, 1), jnp.float32),
        'ag_psi_b': 0.1 * jax.random.normal(keys[10], (1,), jnp.float32),
        # layer: Conv3x3 + BN + ReLU (x2)
        'c1_w': 0.1 * jax.random.normal(keys[11], (nr, Cin_layer, 3, 3), jnp.float32),
        'c1_b': 0.1 * jax.random.normal(keys[12], (nr,), jnp.float32),
        'bn1_gamma': 1.0 + 0.1 * jax.random.normal(keys[13], (nr,), jnp.float32),
        'bn1_beta': 0.1 * jax.random.normal(keys[14], (nr,), jnp.float32),
        'bn1_mean': 0.1 * jax.random.normal(keys[15], (nr,), jnp.float32),
        'bn1_var': 1.0 + 0.5 * jax.random.uniform(keys[16], (nr,), jnp.float32),
        'c2_w': 0.1 * jax.random.normal(keys[17], (nr, nr, 3, 3), jnp.float32),
        'c2_b': 0.1 * jax.random.normal(keys[18], (nr,), jnp.float32),
        'bn2_gamma': 1.0 + 0.1 * jax.random.normal(keys[19], (nr,), jnp.float32),
        'bn2_beta': 0.1 * jax.random.normal(keys[20], (nr,), jnp.float32),
        'bn2_mean': 0.1 * jax.random.normal(keys[21], (nr,), jnp.float32),
        'bn2_var': 1.0 + 0.5 * jax.random.uniform(keys[22], (nr,), jnp.float32),
    }

    out = jax.block_until_ready(attention_gate_up_block(b, s_list, params))
    ref = jax.block_until_ready(reference_forward(b, s_list, params))

    assert out.shape == (N, nr, 2 * Hb, 2 * Wb), out.shape
    # bf16 MXU operands (f32 accumulation) -> relaxed tolerance vs the f32 PyTorch reference.
    if not jnp.allclose(out, ref, atol=5e-2, rtol=5e-2):
        raise AssertionError(f"mismatch vs reference, max abs err = {jnp.max(jnp.abs(out - ref))}")

    print("KERNEL_OK")
</pallas_src>

<mosaic_0001>
module attributes {stable_mosaic.version = 11 : i64} {
  func.func @fused_ag_up_block_kernel(%arg0: i32, %arg1: memref<1x8x128xf32, #tpu.memory_space<vmem>>, %arg2: memref<1x16x128xf32, #tpu.memory_space<vmem>>, %arg3: memref<2x128x128xbf16, #tpu.memory_space<vmem>>, %arg4: memref<1x128xf32, #tpu.memory_space<vmem>>, %arg5: memref<128x128xbf16, #tpu.memory_space<vmem>>, %arg6: memref<1x128xf32, #tpu.memory_space<vmem>>, %arg7: memref<128x128xbf16, #tpu.memory_space<vmem>>, %arg8: memref<128x128xf32, #tpu.memory_space<vmem>>, %arg9: memref<1x1xf32, #tpu.memory_space<vmem>>, %arg10: memref<3x144x128xbf16, #tpu.memory_space<vmem>>, %arg11: memref<3x144x128xbf16, #tpu.memory_space<vmem>>, %arg12: memref<1x128xf32, #tpu.memory_space<vmem>>, %arg13: memref<1x128xf32, #tpu.memory_space<vmem>>, %arg14: memref<3x144x128xbf16, #tpu.memory_space<vmem>>, %arg15: memref<1x128xf32, #tpu.memory_space<vmem>>, %arg16: memref<1x128xf32, #tpu.memory_space<vmem>>, %arg17: memref<1x16x128xf32, #tpu.memory_space<vmem>>, %arg18: memref<18x144xbf16, #tpu.memory_space<vmem>>, %arg19: memref<18x144xbf16, #tpu.memory_space<vmem>>, %arg20: memref<18x144xbf16, #tpu.memory_space<vmem>>) attributes {dimension_semantics = [#tpu.dimension_semantics<parallel>], iteration_bounds = array<i64: 2>, scalar_prefetch = 0 : i64, scratch_operands = 3 : i64, tpu.core_type = #tpu.core_type<tc>, window_params = [{transform_indices = @transform_0, window_bounds = array<i64: 1, 8, 128>}, {transform_indices = @transform_1, window_bounds = array<i64: 1, 16, 128>}, {pipeline_mode = #tpu.pipeline_mode<synchronous>, transform_indices = @transform_2, window_bounds = array<i64: 2, 128, 128>}, {pipeline_mode = #tpu.pipeline_mode<synchronous>, transform_indices = @transform_3, window_bounds = array<i64: 1, 128>}, {pipeline_mode = #tpu.pipeline_mode<synchronous>, transform_indices = @transform_4, window_bounds = array<i64: 128, 128>}, {pipeline_mode = #tpu.pipeline_mode<synchronous>, transform_indices = @transform_5, window_bounds = array<i64: 1, 128>}, {pipeline_mode = #tpu.pipeline_mode<synchronous>, transform_indices = @transform_6, window_bounds = array<i64: 128, 128>}, {pipeline_mode = #tpu.pipeline_mode<synchronous>, transform_indices = @transform_7, window_bounds = array<i64: 128, 128>}, {pipeline_mode = #tpu.pipeline_mode<synchronous>, transform_indices = @transform_8, window_bounds = array<i64: 1, 1>}, {pipeline_mode = #tpu.pipeline_mode<synchronous>, transform_indices = @transform_9, window_bounds = array<i64: 3, 144, 128>}, {pipeline_mode = #tpu.pipeline_mode<synchronous>, transform_indices = @transform_10, window_bounds = array<i64: 3, 144, 128>}, {pipeline_mode = #tpu.pipeline_mode<synchronous>, transform_indices = @transform_11, window_bounds = array<i64: 1, 128>}, {pipeline_mode = #tpu.pipeline_mode<synchronous>, transform_indices = @transform_12, window_bounds = array<i64: 1, 128>}, {pipeline_mode = #tpu.pipeline_mode<synchronous>, transform_indices = @transform_13, window_bounds = array<i64: 3, 144, 128>}, {pipeline_mode = #tpu.pipeline_mode<synchronous>, transform_indices = @transform_14, window_bounds = array<i64: 1, 128>}, {pipeline_mode = #tpu.pipeline_mode<synchronous>, transform_indices = @transform_15, window_bounds = array<i64: 1, 128>}, {transform_indices = @transform_16, window_bounds = array<i64: 1, 16, 128>}]} {
    %c0 = arith.constant 0 : index
    %c0_0 = arith.constant 0 : index
    %c0_1 = arith.constant 0 : index
    %0 = vector.load %arg1[%c0, %c0_0, %c0_1] : memref<1x8x128xf32, #tpu.memory_space<vmem>>, vector<1x8x128xf32>
    %1 = vector.shape_cast %0 : vector<1x8x128xf32> to vector<8x128xf32>
    %2 = arith.truncf %1 : vector<8x128xf32> to vector<8x128xbf16>
    %c0_2 = arith.constant 0 : index
    %c0_3 = arith.constant 0 : index
    %c0_4 = arith.constant 0 : index
    %3 = vector.load %arg3[%c0_2, %c0_3, %c0_4] : memref<2x128x128xbf16, #tpu.memory_space<vmem>>, vector<1x128x128xbf16>
    %4 = vector.shape_cast %3 : vector<1x128x128xbf16> to vector<128x128xbf16>
    %cst = arith.constant dense<0.000000e+00> : vector<8x128xf32>
    %5 = tpu.matmul %2, %4, %cst {dimension_numbers = #tpu.dot_dimension_numbers<[1], [0], [0], [1], [0, 0, 1, 1], [], []>} : vector<8x128xbf16>, vector<128x128xbf16>, vector<8x128xf32> -> vector<8x128xf32>
    %c0_5 = arith.constant 0 : index
    %c0_6 = arith.constant 0 : index
    %6 = vector.load %arg4[%c0_5, %c0_6] : memref<1x128xf32, #tpu.memory_space<vmem>>, vector<1x128xf32>
    %7 = vector.broadcast %6 : vector<1x128xf32> to vector<8x128xf32>
    %8 = arith.addf %5, %7 : vector<8x128xf32>
    %c1 = arith.constant 1 : index
    %c0_7 = arith.constant 0 : index
    %c0_8 = arith.constant 0 : index
    %9 = vector.load %arg3[%c1, %c0_7, %c0_8] : memref<2x128x128xbf16, #tpu.memory_space<vmem>>, vector<1x128x128xbf16>
    %10 = vector.shape_cast %9 : vector<1x128x128xbf16> to vector<128x128xbf16>
    %cst_9 = arith.constant dense<0.000000e+00> : vector<8x128xf32>
    %11 = tpu.matmul %2, %10, %cst_9 {dimension_numbers = #tpu.dot_dimension_numbers<[1], [0], [0], [1], [0, 0, 1, 1], [], []>} : vector<8x128xbf16>, vector<128x128xbf16>, vector<8x128xf32> -> vector<8x128xf32>
    %c0_10 = arith.constant 0 : index
    %c0_11 = arith.constant 0 : index
    %12 = vector.load %arg4[%c0_10, %c0_11] : memref<1x128xf32, #tpu.memory_space<vmem>>, vector<1x128xf32>
    %13 = vector.broadcast %12 : vector<1x128xf32> to vector<8x128xf32>
    %14 = arith.addf %11, %13 : vector<8x128xf32>
    %15 = vector.shape_cast %8 : vector<8x128xf32> to vector<8x1x128xf32>
    %16 = vector.shape_cast %14 : vector<8x128xf32> to vector<8x1x128xf32>
    %17 = tpu.concatenate %15, %16 in 1 : vector<8x1x128xf32>, vector<8x1x128xf32> -> vector<8x2x128xf32>
    %18 = vector.shape_cast %17 : vector<8x2x128xf32> to vector<16x128xf32>
    %c0_12 = arith.constant 0 : index
    %c0_13 = arith.constant 0 : index
    %c0_14 = arith.constant 0 : index
    %19 = vector.load %arg2[%c0_12, %c0_13, %c0_14] : memref<1x16x128xf32, #tpu.memory_space<vmem>>, vector<1x16x128xf32>
    %20 = vector.shape_cast %19 : vector<1x16x128xf32> to vector<16x128xf32>
    %21 = arith.truncf %18 : vector<16x128xf32> to vector<16x128xbf16>
    %c0_15 = arith.constant 0 : index
    %c0_16 = arith.constant 0 : index
    %22 = vector.load %arg5[%c0_15, %c0_16] : memref<128x128xbf16, #tpu.memory_space<vmem>>, vector<128x128xbf16>
    %cst_17 = arith.constant dense<0.000000e+00> : vector<16x128xf32>
    %23 = tpu.matmul %21, %22, %cst_17 {dimension_numbers = #tpu.dot_dimension_numbers<[1], [0], [0], [1], [0, 0, 1, 1], [], []>} : vector<16x128xbf16>, vector<128x128xbf16>, vector<16x128xf32> -> vector<16x128xf32>
    %c0_18 = arith.constant 0 : index
    %c0_19 = arith.constant 0 : index
    %24 = vector.load %arg6[%c0_18, %c0_19] : memref<1x128xf32, #tpu.memory_space<vmem>>, vector<1x128xf32>
    %25 = vector.broadcast %24 : vector<1x128xf32> to vector<16x128xf32>
    %26 = arith.addf %23, %25 : vector<16x128xf32>
    %27 = arith.truncf %20 : vector<16x128xf32> to vector<16x128xbf16>
    %c0_20 = arith.constant 0 : index
    %c0_21 = arith.constant 0 : index
    %28 = vector.load %arg7[%c0_20, %c0_21] : memref<128x128xbf16, #tpu.memory_space<vmem>>, vector<128x128xbf16>
    %cst_22 = arith.constant dense<0.000000e+00> : vector<16x128xf32>
    %29 = tpu.matmul %27, %28, %cst_22 {dimension_numbers = #tpu.dot_dimension_numbers<[1], [0], [0], [1], [0, 0, 1, 1], [], []>} : vector<16x128xbf16>, vector<128x128xbf16>, vector<16x128xf32> -> vector<16x128xf32>
    %30 = arith.addf %26, %29 : vector<16x128xf32>
    %cst_23 = arith.constant 0.000000e+00 : f32
    %31 = vector.broadcast %cst_23 : f32 to vector<16x128xf32>
    %32 = arith.maximumf %30, %31 : vector<16x128xf32>
    %c0_24 = arith.constant 0 : index
    %c0_25 = arith.constant 0 : index
    %33 = vector.load %arg8[%c0_24, %c0_25] : memref<128x128xf32, #tpu.memory_space<vmem>>, vector<128x128xf32>
    %cst_26 = arith.constant dense<0.000000e+00> : vector<16x128xf32>
    %34 = tpu.matmul %32, %33, %cst_26 {dimension_numbers = #tpu.dot_dimension_numbers<[1], [0], [0], [1], [0, 0, 1, 1], [], []>} : vector<16x128xf32>, vector<128x128xf32>, vector<16x128xf32> -> vector<16x128xf32>
    %c0_27 = arith.constant 0 : index
    %c0_28 = arith.constant 0 : index
    %35 = vector.load %arg9[%c0_27, %c0_28] : memref<1x1xf32, #tpu.memory_space<vmem>>, vector<1x1xf32>
    %36 = vector.broadcast %35 : vector<1x1xf32> to vector<16x128xf32>
    %37 = arith.addf %34, %36 : vector<16x128xf32>
    %38 = arith.negf %37 : vector<16x128xf32>
    %39 = math.exp %38 : vector<16x128xf32>
    %cst_29 = arith.constant 1.000000e+00 : f32
    %40 = vector.broadcast %cst_29 : f32 to vector<16x128xf32>
    %41 = arith.addf %40, %39 : vector<16x128xf32>
    %42 = arith.divf %40, %41 : vector<16x128xf32>
    %43 = arith.mulf %20, %42 : vector<16x128xf32>
    %cst_30 = arith.constant 0.000000e+00 : bf16
    %44 = vector.broadcast %cst_30 : bf16 to vector<1x144xbf16>
    %cst_31 = arith.constant 0.000000e+00 : bf16
    %45 = vector.broadcast %cst_31 : bf16 to vector<1x144xbf16>
    %cst_32 = arith.constant 0.000000e+00 : bf16
    %46 = vector.broadcast %cst_32 : bf16 to vector<16x8xbf16>
    %cst_33 = arith.constant 0.000000e+00 : bf16
    %47 = vector.broadcast %cst_33 : bf16 to vector<16x8xbf16>
    %c0_34 = arith.constant 0 : index
    %c0_35 = arith.constant 0 : index
    %48 = vector.load %arg18[%c0_34, %c0_35] : memref<18x144xbf16, #tpu.memory_space<vmem>>, vector<1x144xbf16>
    tpu.vector_store %arg18[%c0_34, %c0_35], %44 {strides = array<i32>} : memref<18x144xbf16, #tpu.memory_space<vmem>>, vector<1x144xbf16>,
    %c17 = arith.constant 17 : index
    %c0_36 = arith.constant 0 : index
    %49 = vector.load %arg18[%c17, %c0_36] : memref<18x144xbf16, #tpu.memory_space<vmem>>, vector<1x144xbf16>
    tpu.vector_store %arg18[%c17, %c0_36], %44 {strides = array<i32>} : memref<18x144xbf16, #tpu.memory_space<vmem>>, vector<1x144xbf16>,
    %c0_37 = arith.constant 0 : index
    %c0_38 = arith.constant 0 : index
    %50 = vector.load %arg19[%c0_37, %c0_38] : memref<18x144xbf16, #tpu.memory_space<vmem>>, vector<1x144xbf16>
    tpu.vector_store %arg19[%c0_37, %c0_38], %45 {strides = array<i32>} : memref<18x144xbf16, #tpu.memory_space<vmem>>, vector<1x144xbf16>,
    %c17_39 = arith.constant 17 : index
    %c0_40 = arith.constant 0 : index
    %51 = vector.load %arg19[%c17_39, %c0_40] : memref<18x144xbf16, #tpu.memory_space<vmem>>, vector<1x144xbf16>
    tpu.vector_store %arg19[%c17_39, %c0_40], %45 {strides = array<i32>} : memref<18x144xbf16, #tpu.memory_space<vmem>>, vector<1x144xbf16>,
    %c0_41 = arith.constant 0 : index
    %c0_42 = arith.constant 0 : index
    %52 = vector.load %arg20[%c0_41, %c0_42] : memref<18x144xbf16, #tpu.memory_space<vmem>>, vector<1x144xbf16>
    tpu.vector_store %arg20[%c0_41, %c0_42], %45 {strides = array<i32>} : memref<18x144xbf16, #tpu.memory_space<vmem>>, vector<1x144xbf16>,
    %c17_43 = arith.constant 17 : index
    %c0_44 = arith.constant 0 : index
    %53 = vector.load %arg20[%c17_43, %c0_44] : memref<18x144xbf16, #tpu.memory_space<vmem>>, vector<1x144xbf16>
    tpu.vector_store %arg20[%c17_43, %c0_44], %45 {strides = array<i32>} : memref<18x144xbf16, #tpu.memory_space<vmem>>, vector<1x144xbf16>,
    %54 = arith.truncf %43 : vector<16x128xf32> to vector<16x128xbf16>
    %55 = tpu.concatenate %46, %54, %46 in 1 : vector<16x8xbf16>, vector<16x128xbf16>, vector<16x8xbf16> -> vector<16x144xbf16>
    %c1_45 = arith.constant 1 : index
    %c0_46 = arith.constant 0 : index
    %56 = vector.load %arg18[%c1_45, %c0_46] : memref<18x144xbf16, #tpu.memory_space<vmem>>, vector<16x144xbf16>
    tpu.vector_store %arg18[%c1_45, %c0_46], %55 {strides = array<i32>} : memref<18x144xbf16, #tpu.memory_space<vmem>>, vector<16x144xbf16>,
    %57 = arith.truncf %18 : vector<16x128xf32> to vector<16x128xbf16>
    %58 = tpu.concatenate %47, %57, %47 in 1 : vector<16x8xbf16>, vector<16x128xbf16>, vector<16x8xbf16> -> vector<16x144xbf16>
    %c1_47 = arith.constant 1 : index
    %c0_48 = arith.constant 0 : index
    %59 = vector.load %arg19[%c1_47, %c0_48] : memref<18x144xbf16, #tpu.memory_space<vmem>>, vector<16x144xbf16>
    tpu.vector_store %arg19[%c1_47, %c0_48], %58 {strides = array<i32>} : memref<18x144xbf16, #tpu.memory_space<vmem>>, vector<16x144xbf16>,
    %cst_49 = arith.constant 0.000000e+00 : f32
    %60 = vector.broadcast %cst_49 : f32 to vector<16x128xf32>
    %c0_50 = arith.constant 0 : index
    %c0_51 = arith.constant 0 : index
    %61 = vector.load %arg18[%c0_50, %c0_51] : memref<18x144xbf16, #tpu.memory_space<vmem>>, vector<16x144xbf16>
    %c0_52 = arith.constant 0 : index
    %c0_53 = arith.constant 0 : index
    %c0_54 = arith.constant 0 : index
    %62 = vector.load %arg10[%c0_52, %c0_53, %c0_54] : memref<3x144x128xbf16, #tpu.memory_space<vmem>>, vector<1x144x128xbf16>
    %63 = vector.shape_cast %62 : vector<1x144x128xbf16> to vector<144x128xbf16>
    %cst_55 = arith.constant dense<0.000000e+00> : vector<16x128xf32>
    %64 = tpu.matmul %61, %63, %cst_55 {dimension_numbers = #tpu.dot_dimension_numbers<[1], [0], [0], [1], [0, 0, 1, 1], [], []>} : vector<16x144xbf16>, vector<144x128xbf16>, vector<16x128xf32> -> vector<16x128xf32>
    %65 = arith.addf %60, %64 : vector<16x128xf32>
    %c0_56 = arith.constant 0 : index
    %c0_57 = arith.constant 0 : index
    %66 = vector.load %arg19[%c0_56, %c0_57] : memref<18x144xbf16, #tpu.memory_space<vmem>>, vector<16x144xbf16>
    %c0_58 = arith.constant 0 : index
    %c0_59 = arith.constant 0 : index
    %c0_60 = arith.constant 0 : index
    %67 = vector.load %arg11[%c0_58, %c0_59, %c0_60] : memref<3x144x128xbf16, #tpu.memory_space<vmem>>, vector<1x144x128xbf16>
    %68 = vector.shape_cast %67 : vector<1x144x128xbf16> to vector<144x128xbf16>
    %cst_61 = arith.constant dense<0.000000e+00> : vector<16x128xf32>
    %69 = tpu.matmul %66, %68, %cst_61 {dimension_numbers = #tpu.dot_dimension_numbers<[1], [0], [0], [1], [0, 0, 1, 1], [], []>} : vector<16x144xbf16>, vector<144x128xbf16>, vector<16x128xf32> -> vector<16x128xf32>
    %70 = arith.addf %65, %69 : vector<16x128xf32>
    %c1_62 = arith.constant 1 : index
    %c0_63 = arith.constant 0 : index
    %71 = vector.load %arg18[%c1_62, %c0_63] : memref<18x144xbf16, #tpu.memory_space<vmem>>, vector<16x144xbf16>
    %c1_64 = arith.constant 1 : index
    %c0_65 = arith.constant 0 : index
    %c0_66 = arith.constant 0 : index
    %72 = vector.load %arg10[%c1_64, %c0_65, %c0_66] : memref<3x144x128xbf16, #tpu.memory_space<vmem>>, vector<1x144x128xbf16>
    %73 = vector.shape_cast %72 : vector<1x144x128xbf16> to vector<144x128xbf16>
    %cst_67 = arith.constant dense<0.000000e+00> : vector<16x128xf32>
    %74 = tpu.matmul %71, %73, %cst_67 {dimension_numbers = #tpu.dot_dimension_numbers<[1], [0], [0], [1], [0, 0, 1, 1], [], []>} : vector<16x144xbf16>, vector<144x128xbf16>, vector<16x128xf32> -> vector<16x128xf32>
    %75 = arith.addf %70, %74 : vector<16x128xf32>
    %c1_68 = arith.constant 1 : index
    %c0_69 = arith.constant 0 : index
    %76 = vector.load %arg19[%c1_68, %c0_69] : memref<18x144xbf16, #tpu.memory_space<vmem>>, vector<16x144xbf16>
    %c1_70 = arith.constant 1 : index
    %c0_71 = arith.constant 0 : index
    %c0_72 = arith.constant 0 : index
    %77 = vector.load %arg11[%c1_70, %c0_71, %c0_72] : memref<3x144x128xbf16, #tpu.memory_space<vmem>>, vector<1x144x128xbf16>
    %78 = vector.shape_cast %77 : vector<1x144x128xbf16> to vector<144x128xbf16>
    %cst_73 = arith.constant dense<0.000000e+00> : vector<16x128xf32>
    %79 = tpu.matmul %76, %78, %cst_73 {dimension_numbers = #tpu.dot_dimension_numbers<[1], [0], [0], [1], [0, 0, 1, 1], [], []>} : vector<16x144xbf16>, vector<144x128xbf16>, vector<16x128xf32> -> vector<16x128xf32>
    %80 = arith.addf %75, %79 : vector<16x128xf32>
    %c2 = arith.constant 2 : index
    %c0_74 = arith.constant 0 : index
    %81 = vector.load %arg18[%c2, %c0_74] : memref<18x144xbf16, #tpu.memory_space<vmem>>, vector<16x144xbf16>
    %c2_75 = arith.constant 2 : index
    %c0_76 = arith.constant 0 : index
    %c0_77 = arith.constant 0 : index
    %82 = vector.load %arg10[%c2_75, %c0_76, %c0_77] : memref<3x144x128xbf16, #tpu.memory_space<vmem>>, vector<1x144x128xbf16>
    %83 = vector.shape_cast %82 : vector<1x144x128xbf16> to vector<144x128xbf16>
    %cst_78 = arith.constant dense<0.000000e+00> : vector<16x128xf32>
    %84 = tpu.matmul %81, %83, %cst_78 {dimension_numbers = #tpu.dot_dimension_numbers<[1], [0], [0], [1], [0, 0, 1, 1], [], []>} : vector<16x144xbf16>, vector<144x128xbf16>, vector<16x128xf32> -> vector<16x128xf32>
    %85 = arith.addf %80, %84 : vector<16x128xf32>
    %c2_79 = arith.constant 2 : index
    %c0_80 = arith.constant 0 : index
    %86 = vector.load %arg19[%c2_79, %c0_80] : memref<18x144xbf16, #tpu.memory_space<vmem>>, vector<16x144xbf16>
    %c2_81 = arith.constant 2 : index
    %c0_82 = arith.constant 0 : index
    %c0_83 = arith.constant 0 : index
    %87 = vector.load %arg11[%c2_81, %c0_82, %c0_83] : memref<3x144x128xbf16, #tpu.memory_space<vmem>>, vector<1x144x128xbf16>
    %88 = vector.shape_cast %87 : vector<1x144x128xbf16> to vector<144x128xbf16>
    %cst_84 = arith.constant dense<0.000000e+00> : vector<16x128xf32>
    %89 = tpu.matmul %86, %88, %cst_84 {dimension_numbers = #tpu.dot_dimension_numbers<[1], [0], [0], [1], [0, 0, 1, 1], [], []>} : vector<16x144xbf16>, vector<144x128xbf16>, vector<16x128xf32> -> vector<16x128xf32>
    %90 = arith.addf %85, %89 : vector<16x128xf32>
    %c0_85 = arith.constant 0 : index
    %c0_86 = arith.constant 0 : index
    %91 = vector.load %arg12[%c0_85, %c0_86] : memref<1x128xf32, #tpu.memory_space<vmem>>, vector<1x128xf32>
    %92 = vector.broadcast %91 : vector<1x128xf32> to vector<16x128xf32>
    %93 = arith.mulf %90, %92 : vector<16x128xf32>
    %c0_87 = arith.constant 0 : index
    %c0_88 = arith.constant 0 : index
    %94 = vector.load %arg13[%c0_87, %c0_88] : memref<1x128xf32, #tpu.memory_space<vmem>>, vector<1x128xf32>
    %95 = vector.broadcast %94 : vector<1x128xf32> to vector<16x128xf32>
    %96 = arith.addf %93, %95 : vector<16x128xf32>
    %cst_89 = arith.constant 0.000000e+00 : f32
    %97 = vector.broadcast %cst_89 : f32 to vector<16x128xf32>
    %98 = arith.maximumf %96, %97 : vector<16x128xf32>
    %99 = arith.truncf %98 : vector<16x128xf32> to vector<16x128xbf16>
    %100 = tpu.concatenate %47, %99, %47 in 1 : vector<16x8xbf16>, vector<16x128xbf16>, vector<16x8xbf16> -> vector<16x144xbf16>
    %c1_90 = arith.constant 1 : index
    %c0_91 = arith.constant 0 : index
    %101 = vector.load %arg20[%c1_90, %c0_91] : memref<18x144xbf16, #tpu.memory_space<vmem>>, vector<16x144xbf16>
    tpu.vector_store %arg20[%c1_90, %c0_91], %100 {strides = array<i32>} : memref<18x144xbf16, #tpu.memory_space<vmem>>, vector<16x144xbf16>,
    %cst_92 = arith.constant 0.000000e+00 : f32
    %102 = vector.broadcast %cst_92 : f32 to vector<16x128xf32>
    %c0_93 = arith.constant 0 : index
    %c0_94 = arith.constant 0 : index
    %103 = vector.load %arg20[%c0_93, %c0_94] : memref<18x144xbf16, #tpu.memory_space<vmem>>, vector<16x144xbf16>
    %c0_95 = arith.constant 0 : index
    %c0_96 = arith.constant 0 : index
    %c0_97 = arith.constant 0 : index
    %104 = vector.load %arg14[%c0_95, %c0_96, %c0_97] : memref<3x144x128xbf16, #tpu.memory_space<vmem>>, vector<1x144x128xbf16>
    %105 = vector.shape_cast %104 : vector<1x144x128xbf16> to vector<144x128xbf16>
    %cst_98 = arith.constant dense<0.000000e+00> : vector<16x128xf32>
    %106 = tpu.matmul %103, %105, %cst_98 {dimension_numbers = #tpu.dot_dimension_numbers<[1], [0], [0], [1], [0, 0, 1, 1], [], []>} : vector<16x144xbf16>, vector<144x128xbf16>, vector<16x128xf32> -> vector<16x128xf32>
    %107 = arith.addf %102, %106 : vector<16x128xf32>
    %c1_99 = arith.constant 1 : index
    %c0_100 = arith.constant 0 : index
    %108 = vector.load %arg20[%c1_99, %c0_100] : memref<18x144xbf16, #tpu.memory_space<vmem>>, vector<16x144xbf16>
    %c1_101 = arith.constant 1 : index
    %c0_102 = arith.constant 0 : index
    %c0_103 = arith.constant 0 : index
    %109 = vector.load %arg14[%c1_101, %c0_102, %c0_103] : memref<3x144x128xbf16, #tpu.memory_space<vmem>>, vector<1x144x128xbf16>
    %110 = vector.shape_cast %109 : vector<1x144x128xbf16> to vector<144x128xbf16>
    %cst_104 = arith.constant dense<0.000000e+00> : vector<16x128xf32>
    %111 = tpu.matmul %108, %110, %cst_104 {dimension_numbers = #tpu.dot_dimension_numbers<[1], [0], [0], [1], [0, 0, 1, 1], [], []>} : vector<16x144xbf16>, vector<144x128xbf16>, vector<16x128xf32> -> vector<16x128xf32>
    %112 = arith.addf %107, %111 : vector<16x128xf32>
    %c2_105 = arith.constant 2 : index
    %c0_106 = arith.constant 0 : index
    %113 = vector.load %arg20[%c2_105, %c0_106] : memref<18x144xbf16, #tpu.memory_space<vmem>>, vector<16x144xbf16>
    %c2_107 = arith.constant 2 : index
    %c0_108 = arith.constant 0 : index
    %c0_109 = arith.constant 0 : index
    %114 = vector.load %arg14[%c2_107, %c0_108, %c0_109] : memref<3x144x128xbf16, #tpu.memory_space<vmem>>, vector<1x144x128xbf16>
    %115 = vector.shape_cast %114 : vector<1x144x128xbf16> to vector<144x128xbf16>
    %cst_110 = arith.constant dense<0.000000e+00> : vector<16x128xf32>
    %116 = tpu.matmul %113, %115, %cst_110 {dimension_numbers = #tpu.dot_dimension_numbers<[1], [0], [0], [1], [0, 0, 1, 1], [], []>} : vector<16x144xbf16>, vector<144x128xbf16>, vector<16x128xf32> -> vector<16x128xf32>
    %117 = arith.addf %112, %116 : vector<16x128xf32>
    %c0_111 = arith.constant 0 : index
    %c0_112 = arith.constant 0 : index
    %118 = vector.load %arg15[%c0_111, %c0_112] : memref<1x128xf32, #tpu.memory_space<vmem>>, vector<1x128xf32>
    %119 = vector.broadcast %118 : vector<1x128xf32> to vector<16x128xf32>
    %120 = arith.mulf %117, %119 : vector<16x128xf32>
    %c0_113 = arith.constant 0 : index
    %c0_114 = arith.constant 0 : index
    %121 = vector.load %arg16[%c0_113, %c0_114] : memref<1x128xf32, #tpu.memory_space<vmem>>, vector<1x128xf32>
    %122 = vector.broadcast %121 : vector<1x128xf32> to vector<16x128xf32>
    %123 = arith.addf %120, %122 : vector<16x128xf32>
    %cst_115 = arith.constant 0.000000e+00 : f32
    %124 = vector.broadcast %cst_115 : f32 to vector<16x128xf32>
    %125 = arith.maximumf %123, %124 : vector<16x128xf32>
    %c0_116 = arith.constant 0 : index
    %c0_117 = arith.constant 0 : index
    %c0_118 = arith.constant 0 : index
    %126 = vector.load %arg17[%c0_116, %c0_117, %c0_118] : memref<1x16x128xf32, #tpu.memory_space<vmem>>, vector<1x16x128xf32>
    %127 = vector.shape_cast %126 : vector<1x16x128xf32> to vector<16x128xf32>
    %128 = vector.shape_cast %125 : vector<16x128xf32> to vector<1x16x128xf32>
    tpu.vector_store %arg17[%c0_116, %c0_117, %c0_118], %128 {strides = array<i32>} : memref<1x16x128xf32, #tpu.memory_space<vmem>>, vector<1x16x128xf32>,
    return
  }
  func.func @transform_0(%arg0: i32) -> (i32, i32, i32) {
    %c0_i32 = arith.constant 0 : i32
    %c0_i32_0 = arith.constant 0 : i32
    %c0_i32_1 = arith.constant 0 : i32
    return %arg0, %c0_i32, %c0_i32_0 : i32, i32, i32
  }
  func.func @transform_1(%arg0: i32) -> (i32, i32, i32) {
    %c0_i32 = arith.constant 0 : i32
    %c0_i32_0 = arith.constant 0 : i32
    %c0_i32_1 = arith.constant 0 : i32
    return %arg0, %c0_i32, %c0_i32_0 : i32, i32, i32
  }
  func.func @transform_2(%arg0: i32) -> (i32, i32, i32) {
    %c0_i32 = arith.constant 0 : i32
    %c0_i32_0 = arith.constant 0 : i32
    %c0_i32_1 = arith.constant 0 : i32
    %c0_i32_2 = arith.constant 0 : i32
    return %c0_i32, %c0_i32_0, %c0_i32_1 : i32, i32, i32
  }
  func.func @transform_3(%arg0: i32) -> (i32, i32) {
    %c0_i32 = arith.constant 0 : i32
    %c0_i32_0 = arith.constant 0 : i32
    %c0_i32_1 = arith.constant 0 : i32
    return %c0_i32, %c0_i32_0 : i32, i32
  }
  func.func @transform_4(%arg0: i32) -> (i32, i32) {
    %c0_i32 = arith.constant 0 : i32
    %c0_i32_0 = arith.constant 0 : i32
    %c0_i32_1 = arith.constant 0 : i32
    return %c0_i32, %c0_i32_0 : i32, i32
  }
  func.func @transform_5(%arg0: i32) -> (i32, i32) {
    %c0_i32 = arith.constant 0 : i32
    %c0_i32_0 = arith.constant 0 : i32
    %c0_i32_1 = arith.constant 0 : i32
    return %c0_i32, %c0_i32_0 : i32, i32
  }
  func.func @transform_6(%arg0: i32) -> (i32, i32) {
    %c0_i32 = arith.constant 0 : i32
    %c0_i32_0 = arith.constant 0 : i32
    %c0_i32_1 = arith.constant 0 : i32
    return %c0_i32, %c0_i32_0 : i32, i32
  }
  func.func @transform_7(%arg0: i32) -> (i32, i32) {
    %c0_i32 = arith.constant 0 : i32
    %c0_i32_0 = arith.constant 0 : i32
    %c0_i32_1 = arith.constant 0 : i32
    return %c0_i32, %c0_i32_0 : i32, i32
  }
  func.func @transform_8(%arg0: i32) -> (i32, i32) {
    %c0_i32 = arith.constant 0 : i32
    %c0_i32_0 = arith.constant 0 : i32
    %c0_i32_1 = arith.constant 0 : i32
    return %c0_i32, %c0_i32_0 : i32, i32
  }
  func.func @transform_9(%arg0: i32) -> (i32, i32, i32) {
    %c0_i32 = arith.constant 0 : i32
    %c0_i32_0 = arith.constant 0 : i32
    %c0_i32_1 = arith.constant 0 : i32
    %c0_i32_2 = arith.constant 0 : i32
    return %c0_i32, %c0_i32_0, %c0_i32_1 : i32, i32, i32
  }
  func.func @transform_10(%arg0: i32) -> (i32, i32, i32) {
    %c0_i32 = arith.constant 0 : i32
    %c0_i32_0 = arith.constant 0 : i32
    %c0_i32_1 = arith.constant 0 : i32
    %c0_i32_2 = arith.constant 0 : i32
    return %c0_i32, %c0_i32_0, %c0_i32_1 : i32, i32, i32
  }
  func.func @transform_11(%arg0: i32) -> (i32, i32) {
    %c0_i32 = arith.constant 0 : i32
    %c0_i32_0 = arith.constant 0 : i32
    %c0_i32_1 = arith.constant 0 : i32
    return %c0_i32, %c0_i32_0 : i32, i32
  }
  func.func @transform_12(%arg0: i32) -> (i32, i32) {
    %c0_i32 = arith.constant 0 : i32
    %c0_i32_0 = arith.constant 0 : i32
    %c0_i32_1 = arith.constant 0 : i32
    return %c0_i32, %c0_i32_0 : i32, i32
  }
  func.func @transform_13(%arg0: i32) -> (i32, i32, i32) {
    %c0_i32 = arith.constant 0 : i32
    %c0_i32_0 = arith.constant 0 : i32
    %c0_i32_1 = arith.constant 0 : i32
    %c0_i32_2 = arith.constant 0 : i32
    return %c0_i32, %c0_i32_0, %c0_i32_1 : i32, i32, i32
  }
  func.func @transform_14(%arg0: i32) -> (i32, i32) {
    %c0_i32 = arith.constant 0 : i32
    %c0_i32_0 = arith.constant 0 : i32
    %c0_i32_1 = arith.constant 0 : i32
    return %c0_i32, %c0_i32_0 : i32, i32
  }
  func.func @transform_15(%arg0: i32) -> (i32, i32) {
    %c0_i32 = arith.constant 0 : i32
    %c0_i32_0 = arith.constant 0 : i32
    %c0_i32_1 = arith.constant 0 : i32
    return %c0_i32, %c0_i32_0 : i32, i32
  }
  func.func @transform_16(%arg0: i32) -> (i32, i32, i32) {
    %c0_i32 = arith.constant 0 : i32
    %c0_i32_0 = arith.constant 0 : i32
    %c0_i32_1 = arith.constant 0 : i32
    return %arg0, %c0_i32, %c0_i32_0 : i32, i32, i32
  }
}

</mosaic_0001>

<bundles_post_ra>
// kernel: tpu_custom_call.1
= control target key start
LH: loop header
LB: loop body
LE: loop exit
PB: predicated region body
PF: predicated region fallthrough
CT: control target
= control target key end

     0   :  { %s4920_s0 = inlined_call_operand.hbm [shape: f32[2,8,128], index: 0, kind: input, shape index: {}]   ;;  %s4921_s1 = inlined_call_operand.hbm [shape: f32[2,16,128], index: 1, kind: input, shape index: {}]   ;;  %s4922_s2 = inlined_call_operand.hbm [shape: bf16[2,128,128], index: 2, kind: input, shape index: {}]   ;;  %s4923_s3 = inlined_call_operand.vmem [shape: f32[1,128], index: 3, kind: input, shape index: {}]   ;;  %s4924_s4 = inlined_call_operand.hbm [shape: bf16[128,128], index: 4, kind: input, shape index: {}]   ;;  %s4925_s5 = inlined_call_operand.vmem [shape: f32[1,128], index: 5, kind: input, shape index: {}]   ;;  %s4926_s6 = inlined_call_operand.hbm [shape: bf16[128,128], index: 6, kind: input, shape index: {}]   ;;  %s4927_s7 = inlined_call_operand.hbm [shape: f32[128,128], index: 7, kind: input, shape index: {}]   ;;  %s4928_s8 = inlined_call_operand.<no memory space> [shape: f32[1,1], index: 8, kind: input, shape index: {}]   ;;  %s4929_s9 = inlined_call_operand.hbm [shape: bf16[3,144,128], index: 9, kind: input, shape index: {}]   ;;  %s4930_s10 = inlined_call_operand.hbm [shape: bf16[3,144,128], index: 10, kind: input, shape index: {}]   ;;  %s4931_s11 = inlined_call_operand.vmem [shape: f32[1,128], index: 11, kind: input, shape index: {}]   ;;  %s4932_s12 = inlined_call_operand.vmem [shape: f32[1,128], index: 12, kind: input, shape index: {}]   ;;  %s4933_s13 = inlined_call_operand.hbm [shape: bf16[3,144,128], index: 13, kind: input, shape index: {}]   ;;  %s4934_s14 = inlined_call_operand.vmem [shape: f32[1,128], index: 14, kind: input, shape index: {}]   ;;  %s4935_s15 = inlined_call_operand.vmem [shape: f32[1,128], index: 15, kind: input, shape index: {}]   ;;  %s4936_s16 = inlined_call_operand.hbm [shape: f32[2,16,128], index: 16, kind: output, shape index: {}]  }
   0x1   :  { %4948 = sst [smem:[#allocation29_spill]] %s4920_s0  ;;  %v21_v0 = vstv %s4928_s8 }
   0x2   :  { %4949 = sst [smem:[#allocation30_spill]] %s4922_s2  ;;  %22 = vst [vmem:[#allocation5] sm:$0x1] %v21_v0 }
   0x3   :  { %4950 = sst [smem:[#allocation31_spill]] %s4924_s4 }
   0x4   :  { %4951 = sst [smem:[#allocation32_spill]] %s4925_s5 }
   0x5   :  { %4952 = sst [smem:[#allocation33_spill]] %s4926_s6 }
   0x6   :  { %4953 = sst [smem:[#allocation34_spill]] %s4927_s7 }
   0x7   :  { %4954 = sst [smem:[#allocation35_spill]] %s4929_s9 }
   0x8   :  { %4955 = sst [smem:[#allocation36_spill]] %s4931_s11 }
   0x9   :  { %4956 = sst [smem:[#allocation37_spill]] %s4932_s12 }
   0xa   :  { %4957 = sst [smem:[#allocation38_spill]] %s4934_s14 }
   0xb   :  { %4958 = sst [smem:[#allocation39_spill]] %s4935_s15 }
   0xc   :  { %4959 = sst [smem:[#allocation40_spill]] %s4936_s16 }
   0xd   :  { %23 = vsyncpa [#allocation7], 0 }
   0xe   :  { %25 = vsyncpa [#allocation7 + $0x1], 0 }
   0xf   :  { %26 = vsyncpa [#allocation10], 0 }
  0x10   :  { %28 = vsyncpa [#allocation10 + $0x1], 0 }
  0x11   :  { %29 = vsyncpa [#allocation13], 0 }
  0x12   :  { %30 = vsyncpa [#allocation16], 0 }
  0x13   :  { %31 = vsyncpa [#allocation19], 0 }
  0x14   :  { %32 = vsyncpa [#allocation8], 0 }
  0x15   :  { %34 = vsyncpa [#allocation8 + $0x1], 0  ;;  %s4215_s23 = smov 0   ;;  %s4217_s24 = smov 0  }
  0x16   :  { %s4219_s25 = smov 0   ;;  %s4221_s26 = smov 0  }
  0x17 LB: > { %s4106_s8 = smov [#allocation11]   ;;  %s4236_s28 = sadd.s32 4294967295, %s4104_s26   ;;  %s4104_s26 = sphi %s4221_s26, %s5008_s26   ;;  %s4100_s25 = sphi %s4219_s25, %s5007_s25   ;;  %s4096_s24 = sphi %s4217_s24, %s5006_s24   ;;  %s4092_s23 = sphi %s4215_s23, %s5005_s23  }
  0x18   : > { %s429_s27 = sshll.u32 %s4106_s8, 4  ;;  %p3073_p0 = scmp.ge.s32.totalorder %s4104_s26, 1  ;;  %s4241_s27 = int_to_ptr.vmem [resolvable:$true] %s429_s27 }
  0x19   : > { %p4943_p1 = scmp.eq.s32.totalorder %s4236_s28, 0  ;;  %p417_p2 = scmp.lt.s32.totalorder %s4104_s26, 3 }
  0x1a   : > { %s4107_s30 = smov [#allocation12]   ;;  %s4108_s18 = smov [#allocation15]  }
  0x1b   : > { %p4243_p3 = pnand %p3073_p0, %p417_p2  ;;  %s445_s0 = sshll.u32 %s4107_s30, 4  ;;  %s4256_s0 = int_to_ptr.vmem [resolvable:$true] %s445_s0 }
  0x1c   : > { %s474_s19 = sshll.u32 %s4108_s18, 4  ;;  %s4962_s2 = sld [smem:[#allocation30_spill]]  ;;  %s4258_s19 = int_to_ptr.vmem [resolvable:$true] %s474_s19 }
  0x1d   : > { %s4960_s29 = scalar_select %p4243_p3, 1, 0 }
  0x1e   : > { %p3531_p5 = pneg %p4243_p3 }
  0x20   : > { %p4252_p6 = pnand %p3531_p5, %p4943_p1 }
  0x22   : > { %s3762_s22 = scalar_lea.hbm %s4962_s2, 2048  ;;  %p4268_p8 = pneg %p4252_p6 }
  0x23   : > { %p3763_p7 = scmp.ne.s32.totalorder %s4962_s2, %s3762_s22  ;;  %p3769_p11 = scmp.lt.u32.totalorder %s3762_s22, %s4962_s2 }
  0x25   : > { %p3765_p9 = pnand %p4268_p8, %p3763_p7 }
  0x27   : > { %p3766_p10 = pneg %p3765_p9 }
  0x29   : > { %p3771_p12 = pnand %p3769_p11, %p3766_p10 }
  0x2b   : > { %3774 = shalt.err (!%p3771_p12)
}
  0x2c   : > { %s3775_s16 = scalar_lea.vmem %s4241_s27, 2048  ;;  %p3783_p5 = scmp.lt.s32.totalorder %s4241_s27, %s4241_s27 }
  0x2d   : > { %p3776_p13 = scmp.ne.s32.totalorder %s4241_s27, %s3775_s16  ;;  %p3784_p4 = scmp.lt.s32.totalorder %s3775_s16, %s3775_s16 }
  0x2f   : > { %p3778_p0 = pnand %p3776_p13, %p4268_p8  ;;  %p3785_p7 = por %p3784_p4, %p3783_p5 }
  0x31   : > { %p3779_p2 = pneg %p3778_p0 }
  0x33   : > { %p3786_p9 = pnand %p3785_p7, %p3779_p2 }
  0x35   : > { %3789 = shalt.err (!%p3786_p9)
}
  0x36   : > { %s4939_s20 = smov 64   ;;  %s4941_s15 = smov 4  }
  0x37   : > { %3534 = dma.hbm_to_vmem [thread:$0]  (!%p4252_p6), %s4962_s2, 2048, %s4241_s27, [#allocation10], %s4939_s20, %s4939_s20, %s4941_s15  }
  0x38   : > { %s4964_s4 = sld [smem:[#allocation31_spill]] }
  0x3e   : > { %s3790_s16 = scalar_lea.hbm %s4964_s4, 1024 }
  0x3f   : > { %p3791_p4 = scmp.ne.s32.totalorder %s4964_s4, %s3790_s16  ;;  %p3797_p12 = scmp.lt.u32.totalorder %s3790_s16, %s4964_s4 }
  0x41   : > { %p3793_p10 = pnand %p3791_p4, %p4268_p8 }
  0x43   : > { %p3794_p11 = pneg %p3793_p10 }
  0x45   : > { %p3799_p13 = pnand %p3797_p12, %p3794_p11 }
  0x47   : > { %3802 = shalt.err (!%p3799_p13)
}
  0x48   : > { %s3803_s27 = scalar_lea.vmem %s4256_s0, 1024  ;;  %p3811_p7 = scmp.lt.s32.totalorder %s4256_s0, %s4256_s0 }
  0x49   : > { %p3804_p0 = scmp.ne.s32.totalorder %s4256_s0, %s3803_s27  ;;  %p3812_p9 = scmp.lt.s32.totalorder %s3803_s27, %s3803_s27 }
  0x4b   : > { %p3806_p2 = pnand %p3804_p0, %p4268_p8  ;;  %p3813_p4 = por %p3812_p9, %p3811_p7 }
  0x4d   : > { %p3807_p5 = pneg %p3806_p2 }
  0x4f   : > { %p3814_p10 = pnand %p3813_p4, %p3807_p5 }
  0x51   : > { %3817 = shalt.err (!%p3814_p10)
}
  0x52   : > { %3537 = dma.hbm_to_vmem [thread:$0]  (!%p4252_p6), %s4964_s4, 1024, %s4256_s0, [#allocation13], %s4939_s20, %s4939_s20, %s4941_s15  }
  0x53   : > { %s4965_s7 = sld [smem:[#allocation34_spill]] }
  0x59   : > { %s3818_s21 = scalar_lea.hbm %s4965_s7, 2048 }
  0x5a   : > { %p3819_p11 = scmp.ne.s32.totalorder %s4965_s7, %s3818_s21  ;;  %p3825_p0 = scmp.lt.u32.totalorder %s3818_s21, %s4965_s7 }
  0x5c   : > { %p3821_p12 = pnand %p3819_p11, %p4268_p8 }
  0x5e   : > { %p3822_p13 = pneg %p3821_p12 }
  0x60   : > { %p3827_p2 = pnand %p3825_p0, %p3822_p13 }
  0x62   : > { %3830 = shalt.err (!%p3827_p2)
}
  0x63   : > { %s3831_s0 = scalar_lea.vmem %s4258_s19, 2048  ;;  %p3839_p4 = scmp.lt.s32.totalorder %s4258_s19, %s4258_s19 }
  0x64   : > { %p3832_p5 = scmp.ne.s32.totalorder %s4258_s19, %s3831_s0  ;;  %p3840_p10 = scmp.lt.s32.totalorder %s3831_s0, %s3831_s0 }
  0x66   : > { %p3834_p7 = pnand %p3832_p5, %p4268_p8  ;;  %p3841_p11 = por %p3840_p10, %p3839_p4 }
  0x68   : > { %p3835_p9 = pneg %p3834_p7 }
  0x6a   : > { %p3842_p12 = pnand %p3841_p11, %p3835_p9 }
  0x6c   : > { %3845 = shalt.err (!%p3842_p12)
}
  0x6d   : > { %s4945_s27 = smov 128   ;;  %s4946_s5 = smov 8  }
  0x6e   : > { %3543 = dma.hbm_to_vmem [thread:$0]  (!%p4252_p6), %s4965_s7, 2048, %s4258_s19, [#allocation16], %s4945_s27, %s4945_s27, %s4946_s5  }
  0x6f   : > { %s4113_s14 = smov [#allocation18]   ;;  %s4114_s22 = smov [#allocation14]  }
  0x70   : > { %s503_s21 = sshll.u32 %s4113_s14, 4  ;;  %s461_s8 = sshll.u32 %s4114_s22, 4  ;;  %s504_s21 = int_to_ptr.vmem [resolvable:$true] %s503_s21  ;;  %s462_s8 = int_to_ptr.vmem [resolvable:$true] %s461_s8 }
  0x71   : > { %s3846_s0 = scalar_lea.hbm %s4930_s10, 3456 }
  0x72   : > { %p3847_p13 = scmp.ne.s32.totalorder %s4930_s10, %s3846_s0  ;;  %p3853_p5 = scmp.lt.u32.totalorder %s3846_s0, %s4930_s10 }
  0x74   : > { %p3849_p0 = pnand %p3847_p13, %p4268_p8 }
  0x76   : > { %p3850_p2 = pneg %p3849_p0 }
  0x78   : > { %p3855_p7 = pnand %p3853_p5, %p3850_p2 }
  0x7a   : > { %3858 = shalt.err (!%p3855_p7)
}
  0x7b   : > { %s3859_s19 = scalar_lea.vmem %s504_s21, 3456  ;;  %p3867_p11 = scmp.lt.s32.totalorder %s504_s21, %s504_s21 }
  0x7c   : > { %p3860_p9 = scmp.ne.s32.totalorder %s504_s21, %s3859_s19  ;;  %p3868_p12 = scmp.lt.s32.totalorder %s3859_s19, %s3859_s19 }
  0x7e   : > { %p3862_p4 = pnand %p3860_p9, %p4268_p8  ;;  %p3869_p1 = por %p3868_p12, %p3867_p11 }
  0x80   : > { %p3863_p10 = pneg %p3862_p4 }
  0x82   : > { %p3870_p3 = pnand %p3869_p1, %p3863_p10 }
  0x84   : > { %3873 = shalt.err (!%p3870_p3)
}
  0x85   : > { %s4966_s20 = smov 4   ;;  %s4967_s15 = smov 64  }
  0x86   : > { %3549 = dma.hbm_to_vmem [thread:$0]  (!%p4252_p6), %s4930_s10, 3456, %s504_s21, [#allocation19], %s4967_s15, %s4967_s15, %s4966_s20  }
  0x87   : > { %s4968_s6 = sld [smem:[#allocation33_spill]] }
  0x8d   : > { %s3874_s14 = scalar_lea.hbm %s4968_s6, 1024 }
  0x8e   : > { %p3875_p1 = scmp.ne.s32.totalorder %s4968_s6, %s3874_s14  ;;  %p3881_p0 = scmp.lt.u32.totalorder %s3874_s14, %s4968_s6 }
  0x90   : > { %p3877_p3 = pnand %p3875_p1, %p4268_p8 }
  0x92   : > { %p3878_p13 = pneg %p3877_p3 }
  0x94   : > { %p3883_p2 = pnand %p3881_p0, %p3878_p13 }
  0x96   : > { %3886 = shalt.err (!%p3883_p2)
}
  0x97   : > { %s3887_s19 = scalar_lea.vmem %s462_s8, 1024  ;;  %p3895_p4 = scmp.lt.s32.totalorder %s462_s8, %s462_s8 }
  0x98   : > { %p3888_p5 = scmp.ne.s32.totalorder %s462_s8, %s3887_s19  ;;  %p3896_p10 = scmp.lt.s32.totalorder %s3887_s19, %s3887_s19 }
  0x9a   : > { %p3890_p7 = pnand %p3888_p5, %p4268_p8  ;;  %p3897_p11 = por %p3896_p10, %p3895_p4 }
  0x9c   : > { %p3891_p9 = pneg %p3890_p7 }
  0x9e   : > { %p3898_p12 = pnand %p3897_p11, %p3891_p9 }
  0xa0   : > { %3901 = shalt.err (!%p3898_p12)
}
  0xa1   : > { %3540 = dma.hbm_to_vmem [thread:$0]  (!%p4252_p6), %s4968_s6, 1024, %s462_s8, [#allocation13], %s4967_s15, %s4967_s15, %s4966_s20  }
  0xa2   : > { %s4115_s4 = smov [#allocation17]   ;;  %s4116_s12 = smov [#allocation20]  }
  0xa3   : > { %s490_s11 = sshll.u32 %s4115_s4, 4  ;;  %s522_s14 = sshll.u32 %s4116_s12, 4  ;;  %s491_s11 = int_to_ptr.vmem [resolvable:$true] %s490_s11  ;;  %s523_s14 = int_to_ptr.vmem [resolvable:$true] %s522_s14 }
  0xa4   : > { %s4969_s9 = sld [smem:[#allocation35_spill]] }
  0xaa   : > { %s3902_s16 = scalar_lea.hbm %s4969_s9, 3456 }
  0xab   : > { %p3903_p1 = scmp.ne.s32.totalorder %s4969_s9, %s3902_s16  ;;  %p3909_p0 = scmp.lt.u32.totalorder %s3902_s16, %s4969_s9 }
  0xad   : > { %p3905_p3 = pnand %p3903_p1, %p4268_p8 }
  0xaf   : > { %p3906_p13 = pneg %p3905_p3 }
  0xb1   : > { %p3911_p2 = pnand %p3909_p0, %p3906_p13 }
  0xb3   : > { %3914 = shalt.err (!%p3911_p2)
}
  0xb4   : > { %s3915_s8 = scalar_lea.vmem %s491_s11, 3456  ;;  %p3923_p4 = scmp.lt.s32.totalorder %s491_s11, %s491_s11 }
  0xb5   : > { %p3916_p5 = scmp.ne.s32.totalorder %s491_s11, %s3915_s8  ;;  %p3924_p10 = scmp.lt.s32.totalorder %s3915_s8, %s3915_s8 }
  0xb7   : > { %p3918_p7 = pnand %p3916_p5, %p4268_p8  ;;  %p3925_p11 = por %p3924_p10, %p3923_p4 }
  0xb9   : > { %p3919_p9 = pneg %p3918_p7 }
  0xbb   : > { %p3926_p12 = pnand %p3925_p11, %p3919_p9 }
  0xbd   : > { %3929 = shalt.err (!%p3926_p12)
}
  0xbe   : > { %3546 = dma.hbm_to_vmem [thread:$0]  (!%p4252_p6), %s4969_s9, 3456, %s491_s11, [#allocation16], %s4967_s15, %s4967_s15, %s4966_s20  }
  0xbf   : > { %s3930_s22 = scalar_lea.hbm %s4933_s13, 3456 }
  0xc0   : > { %p3931_p1 = scmp.ne.s32.totalorder %s4933_s13, %s3930_s22  ;;  %p3937_p0 = scmp.lt.u32.totalorder %s3930_s22, %s4933_s13 }
  0xc2   : > { %p3933_p3 = pnand %p3931_p1, %p4268_p8 }
  0xc4   : > { %p3934_p13 = pneg %p3933_p3 }
  0xc6   : > { %p3939_p2 = pnand %p3937_p0, %p3934_p13 }
  0xc8   : > { %3942 = shalt.err (!%p3939_p2)
}
  0xc9   : > { %s3943_s21 = scalar_lea.vmem %s523_s14, 3456  ;;  %p3951_p4 = scmp.lt.s32.totalorder %s523_s14, %s523_s14 }
  0xca   : > { %p3944_p5 = scmp.ne.s32.totalorder %s523_s14, %s3943_s21  ;;  %p3952_p10 = scmp.lt.s32.totalorder %s3943_s21, %s3943_s21 }
  0xcc   : > { %p3946_p7 = pnand %p3944_p5, %p4268_p8  ;;  %p3953_p11 = por %p3952_p10, %p3951_p4 }
  0xce   : > { %p3947_p9 = pneg %p3946_p7 }
  0xd0   : > { %p3954_p12 = pnand %p3953_p11, %p3947_p9 }
  0xd2   : > { %3957 = shalt.err (!%p3954_p12)
}
  0xd3   : > { %3552 = dma.hbm_to_vmem [thread:$0]  (!%p4252_p6), %s4933_s13, 3456, %s523_s14, [#allocation19], %s4967_s15, %s4967_s15, %s4966_s20  }
  0xd4   : > { %s3072_s17 = sadd.s32 4294967294, %s4104_s26   ;;  %s4430_s30 = sadd.s32 1, %s4104_s26  }
  0xd5   : > { %s47_s27 = sadd.s32 1, %s4100_s25  ;;  %s44_s2 = ssub.s32 %s4104_s26, %s4430_s30 }
  0xd6   : > { %p54_p8 = scmp.ne.s32.totalorder %s4100_s25, %s4096_s24  ;;  %p45_p1 = scmp.eq.s32.totalorder %s44_s2, 0 }
  0xd7   : > { %p55_p3 = scmp.eq.s32.totalorder %s4104_s26, 0  ;;  %p60_p13 = scmp.ne.s32.totalorder %s4096_s24, %s4092_s23 }
  0xd8   : > { %p404_p0 = scmp.eq.s32.totalorder %s4236_s28, 1  ;;  %p4970_p5 = scmp.eq.s32.totalorder %s4236_s28, 0 }
  0xd9   : > { %s4442_s4 = scalar_select %p45_p1, %s4100_s25, %s47_s27  }
  0xda   : > { %p56_p2 = por %p55_p3, %p54_p8  ;;  %p4446_p7 = por %p4970_p5, %p60_p13 }
  0xdb   : > { %p4450_p6 = por %p404_p0, %p54_p8  ;;  %p410_p9 = scmp.eq.s32.totalorder %s3072_s17, 1 }
  0xdc   : > { %p3571_p4 = scmp.lt.s32.totalorder %s4104_s26, 2  ;;  %s4456_s15 = sand.u32 1, %s4100_s25  }
  0xdd   : > { %s4972_s20 = scalar_select %p4450_p6, 1, 0 }
  0xde   : > { %p4458_p10 = por %p410_p9, %p60_p13  ;;  %s3082_s22 = sshll.u32 %s4456_s15, 3 }
  0xdf   : > { %s3083_s18 = sshll.u32 %s4104_s26, 7  ;;  %s4974_s19 = sld [smem:[#allocation29_spill]] }
  0xe0   : > { %s4973_s14 = scalar_select %p4458_p10, 1, 0 }
  0xe1   : > { %s546_s11 = scalar_lea.vmem [#allocation6], %s3082_s22  ;;  %p4469_p11 = pnand %p3571_p4, %p56_p2 }
  0xe2   : > { %s553_s8 = sshll.u32 %s546_s11, 4  ;;  %s543_s2 = scalar_lea.sflag [#allocation7], %s4456_s15  ;;  %s4473_s8 = int_to_ptr.vmem [resolvable:$true] %s553_s8 }
  0xe3   : > { %p3960_p8 = pneg %p4469_p11 }
  0xe5   : > { %s4467_s21 = scalar_lea.hbm %s4974_s19, %s3083_s18  ;;  %s3963_s16 = scalar_lea.hbm %s4974_s19, 256 }
  0xe6   : > { %s3958_s5 = scalar_lea.hbm %s4467_s21, 128  ;;  %p3964_p13 = scmp.lt.u32.totalorder %s4467_s21, %s4974_s19 }
  0xe7   : > { %p3959_p12 = scmp.ne.s32.totalorder %s4467_s21, %s3958_s5  ;;  %p3965_p0 = scmp.lt.u32.totalorder %s3963_s16, %s3958_s5 }
  0xe8   : > { %p3967_p5 = scmp.lt.u32.totalorder %s3958_s5, %s4467_s21 }
  0xe9   : > { %p3961_p1 = pnand %p3960_p8, %p3959_p12  ;;  %p3966_p2 = por %p3965_p0, %p3964_p13 }
  0xeb   : > { %p3962_p3 = pneg %p3961_p1  ;;  %p3968_p9 = por %p3967_p5, %p3966_p2 }
  0xed   : > { %p3969_p4 = pnand %p3968_p9, %p3962_p3 }
  0xef   : > { %3972 = shalt.err (!%p3969_p4)
}
  0xf0   : > { %s3973_s27 = scalar_lea.vmem %s4473_s8, 128  ;;  %s4117_s22 = smov [#allocation6]  }
  0xf1   : > { %p3974_p12 = scmp.ne.s32.totalorder %s4473_s8, %s3973_s27  ;;  %s3978_s18 = sshll.u32 %s4117_s22, 4  ;;  %s3979_s18 = int_to_ptr.vmem [resolvable:$false] %s3978_s18 }
  0xf2   : > { %s3980_s0 = scalar_lea.vmem %s3979_s18, 256  ;;  %p3981_p6 = scmp.lt.s32.totalorder %s4473_s8, %s3979_s18 }
  0xf3   : > { %p3976_p1 = pnand %p3974_p12, %p3960_p8  ;;  %p3982_p13 = scmp.lt.s32.totalorder %s3980_s0, %s3973_s27 }
  0xf5   : > { %p3977_p10 = pneg %p3976_p1  ;;  %p3983_p0 = por %p3982_p13, %p3981_p6 }
  0xf7   : > { %p3984_p2 = pnand %p3983_p0, %p3977_p10 }
  0xf9   : > { %3987 = shalt.err (!%p3984_p2)
}
  0xfa   : > { %3556 = dma.hbm_to_vmem [thread:$0]  (!%p4469_p11), %s4467_s21, 128, %s4473_s8, %s543_s2  }
  0xfb   : > { %s4976_s5 = sshll.u32 %s4456_s15, 4  ;;  %s560_s22 = sand.u32 1, %s4104_s26  }
  0xfc   : > { %s564_s16 = scalar_lea.vmem [#allocation9], %s4976_s5  ;;  %s3262_s18 = sshll.u32 %s4104_s26, 8 }
  0xfd   : > { %s571_s11 = sshll.u32 %s564_s16, 4  ;;  %s4511_s6 = scalar_lea.hbm %s4921_s1, %s3262_s18  ;;  %s4505_s11 = int_to_ptr.vmem [resolvable:$true] %s571_s11 }
  0xfe   : > { %s4513_s7 = scalar_lea.sflag [#allocation10], %s560_s22  ;;  %s3988_s9 = scalar_lea.hbm %s4511_s6, 256 }
  0xff   : > { %p3989_p6 = scmp.ne.s32.totalorder %s4511_s6, %s3988_s9  ;;  %s3993_s8 = scalar_lea.hbm %s4921_s1, 512 }
 0x100   : > { %p3994_p5 = scmp.lt.u32.totalorder %s4511_s6, %s4921_s1  ;;  %p3995_p9 = scmp.lt.u32.totalorder %s3993_s8, %s3988_s9 }
 0x101   : > { %p3991_p10 = pnand %p3989_p6, %p3960_p8  ;;  %p3997_p12 = scmp.lt.u32.totalorder %s3988_s9, %s4511_s6 }
 0x102   : > { %p3996_p4 = por %p3995_p9, %p3994_p5 }
 0x103   : > { %p3992_p3 = pneg %p3991_p10 }
 0x104   : > { %p3998_p1 = por %p3997_p12, %p3996_p4 }
 0x106   : > { %p3999_p13 = pnand %p3998_p1, %p3992_p3 }
 0x108   : > { %4002 = shalt.err (!%p3999_p13)
}
 0x109   : > { %s4003_s16 = scalar_lea.vmem %s4505_s11, 256  ;;  %s4118_s22 = smov [#allocation9]  }
 0x10a   : > { %p4004_p0 = scmp.ne.s32.totalorder %s4505_s11, %s4003_s16  ;;  %s4008_s18 = sshll.u32 %s4118_s22, 4  ;;  %s4009_s18 = int_to_ptr.vmem [resolvable:$false] %s4008_s18 }
 0x10b   : > { %s4010_s27 = scalar_lea.vmem %s4009_s18, 512  ;;  %p4011_p10 = scmp.lt.s32.totalorder %s4505_s11, %s4009_s18 }
 0x10c   : > { %p4006_p2 = pnand %p4004_p0, %p3960_p8  ;;  %p4012_p5 = scmp.lt.s32.totalorder %s4010_s27, %s4003_s16 }
 0x10e   : > { %p4007_p6 = pneg %p4006_p2  ;;  %p4013_p9 = por %p4012_p5, %p4011_p10 }
 0x110   : > { %p4014_p4 = pnand %p4013_p9, %p4007_p6 }
 0x112   : > { %4017 = shalt.err (!%p4014_p4)
}
 0x113   : > { %s4977_s9 = smov 8   ;;  %s4978_s0 = smov 128  }
 0x114   : > { %3559 = dma.hbm_to_vmem [thread:$0]  (!%p4469_p11), %s4511_s6, 256, %s4505_s11, %s4513_s7, %s4978_s0, %s4978_s0, %s4977_s9  }
 0x115   : > { %p4979_p8 = scmp.ne.s32.totalorder %s4960_s29, 0 }
 0x116   : > { %s4545_s15 = sand.u32 (!%p4979_p8), 1, %s4096_s24  }
 0x117   : > { %583 = sbr.rel (%p4979_p8) target bundleno = 2022 (0x7e6), region = 84  ;;  %s3088_s21 = sshll.u32 (!%p4979_p8), %s4545_s15, 3 }
 0x118   : > { %s586_s8 = scalar_lea.sflag (!%p4979_p8), [#allocation7], %s4545_s15  ;;  %s4549_s2 = scalar_lea.vmem (!%p4979_p8), [#allocation6], %s3088_s21 }
 0x11e   : > { %4063 = dma.done.wait (%p4446_p7), %s586_s8, 128  }
 0x11f   : > { %4065 = vsyncadd (%p4446_p7), %s586_s8, 4294967168  ;;  %s594_s6 = sand.u32 1, %s4236_s28   ;;  %s3089_s7 = sshll.u32 %s4545_s15, 4 }
 0x120   : > { %s595_s29 = scalar_lea.sflag [#allocation10], %s594_s6  ;;  %s4559_s17 = scalar_lea.vmem [#allocation9], %s3089_s7 }
 0x121   : > { %4067 = dma.done.wait (%p4446_p7), %s595_s29, 256  }
 0x122   : > { %4069 = vsyncadd (%p4446_p7), %s595_s29, 4294967040  ;;  %p4980_p11 = scmp.eq.s32.totalorder %s4236_s28, 0 }
 0x124   : > { %4071 = dma.done.wait (%p4980_p11), [#allocation10], 2048   ;;  %p4981_p3 = pmov %p4980_p11 }
 0x126   : > { %4073 = vsyncadd (%p4981_p3), [#allocation10], 4294965248  ;;  %p4982_p12 = pmov %p4981_p3 }
 0x127   : > { %p4983_p1 = pmov %p4981_p3 }
 0x128   : > { %4075 = dma.done.wait (%p4982_p12), [#allocation13], 2048  }
 0x129   : > { %4077 = vsyncadd (%p4983_p1), [#allocation13], 4294965248  ;;  %p4984_p13 = pmov %p4983_p1 }
 0x12a   : > { %p4985_p0 = pmov %p4983_p1 }
 0x12b   : > { %4079 = dma.done.wait (%p4984_p13), [#allocation16], 5504  }
 0x12c   : > { %4081 = vsyncadd (%p4985_p0), [#allocation16], 4294961792  ;;  %p4986_p7 = pmov %p4985_p0 }
 0x12d   : > { %p4987_p2 = pmov %p4985_p0 }
 0x12e   : > { %4083 = dma.done.wait (%p4986_p7), [#allocation19], 6912  }
 0x12f   : > { %4085 = vsyncadd (%p4987_p2), [#allocation19], 4294960384  ;;  %v4119_v1 = vmov 0.0   ;;  %vm4120_vm0 = vmmov 0   ;;  %v3631_v2 = vld [vmem:[#allocation11] sm:$0xff]   ;;  %v3633_v4 = vld [vmem:[#allocation11 + $0x8] sm:$0xff]   ;;  %v904_v41 = vlaneseq }
 0x130   : > { %3318 = vmatprep.subr.bf16.mxu0 %v4119_v1  ;;  %3338 = vmatprep.subr.bf16.mxu1 %v4119_v1  ;;  %v3632_v3 = vld [vmem:[#allocation11 + $0x40] sm:$0xff]   ;;  %v3634_v5 = vld [vmem:[#allocation11 + $0x48] sm:$0xff]   ;;  %v3635_v6 = vld [vmem:[#allocation11 + $0x10] sm:$0xff]   ;;  %v4121_v28 = vmov 0   ;;  %vm1047_vm1 = vcmask 1040384   ;;  %vm1443_vm3 = vcmask 126980  }
 0x131   : > { %3334 = vmatprep.mubr.msk.bf16.mxu0 %vm4120_vm0, %v4119_v1  ;;  %3354 = vmatprep.mubr.msk.bf16.mxu1 %vm4120_vm0, %v4119_v1  ;;  %v3636_v7 = vld [vmem:[#allocation11 + $0x50] sm:$0xff]   ;;  %v3637_v8 = vld [vmem:[#allocation11 + $0x18] sm:$0xff]   ;;  %v3639_v10 = vld [vmem:[#allocation11 + $0x20] sm:$0xff]   ;;  %vm1441_vm2 = vsmask.f32 256  ;;  %vm1509_vm12 = vcmask 1043456  }
 0x132   : > { %3319 = vmatpush3.bf16.msra.mxu0 %v3631_v2  ;;  %3339 = vmatpush3.bf16.msra.mxu1 %v3632_v3  ;;  %v3638_v9 = vld [vmem:[#allocation11 + $0x58] sm:$0xff]   ;;  %v3640_v11 = vld [vmem:[#allocation11 + $0x60] sm:$0xff]   ;;  %v3641_v12 = vld [vmem:[#allocation11 + $0x28] sm:$0xff]   ;;  %vm1444_vm4 = vsmask.f32 4352  ;;  %vm1511_vm14 = vcmask 130052  }
 0x133   : > { %3320 = vmatprep.subr.bf16.mxu0 %v4119_v1  ;;  %3340 = vmatprep.subr.bf16.mxu1 %v4119_v1  ;;  %v3642_v13 = vld [vmem:[#allocation11 + $0x68] sm:$0xff]   ;;  %v3643_v14 = vld [vmem:[#allocation11 + $0x30] sm:$0xff]   ;;  %v3645_v16 = vld [vmem:[#allocation11 + $0x38] sm:$0xff]   ;;  %vm1450_vm6 = vsmask.f32 7938  ;;  %v905_v43 = vshrl.u32 %v904_v41, 7 }
 0x134   : > { %v3644_v15 = vld [vmem:[#allocation11 + $0x70] sm:$0xff]   ;;  %v3646_v18 = vld [vmem:[#allocation11 + $0x78] sm:$0xff]   ;;  %v3647_v19 = vld [vmem:[#allocation12] sm:$0xff]   ;;  %3630 = vset.pattern.permute.xlu0 %v4121_v28  ;;  %vm1452_vm8 = vsmask.f32 7954  ;;  %s4124_s5 = smov 8  }
 0x135   : > { %v681_v17 = vld [vmem:[%s4549_s2] sm:$0xff]  ;;  %v3648_v21 = vld [vmem:[#allocation12 + $0x8] sm:$0xff]   ;;  %v3651_v24 = vld [vmem:[#allocation12 + $0x20] sm:$0xff]   ;;  %v4122_v39 = vmov 1966171168   ;;  %v1009_v2 = vsub.s32 0, %v905_v43 }
 0x136   : > { %3321 = vmatpush3.bf16.msra.mxu0 %v3633_v4  ;;  %3341 = vmatpush3.bf16.msra.mxu1 %v3634_v5  ;;  %v682_v20 = vpack.c.bf16 %v681_v17, %v681_v17  ;;  %v3649_v22 = vld [vmem:[#allocation12 + $0x10] sm:$0xff]   ;;  %v3650_v23 = vld [vmem:[#allocation12 + $0x18] sm:$0xff]   ;;  %v3652_v25 = vld [vmem:[#allocation12 + $0x28] sm:$0xff]   ;;  %v902_v40 = vunpack.c.l.s4 %v4122_v39  ;;  %v4123_v53 = vmov 1983009808   ;;  %s4996_s18 = sld [smem:[#allocation32_spill]] }
 0x137   : > { %3322 = vmatprep.subr.bf16.mxu0 %v4119_v1  ;;  %3342 = vmatprep.subr.bf16.mxu1 %v4119_v1  ;;  %v3653_v26 = vld [vmem:[#allocation12 + $0x30] sm:$0xff]   ;;  %v3654_v27 = vld [vmem:[#allocation12 + $0x38] sm:$0xff]   ;;  %vm1442_vm5 = vmand %vm1047_vm1, %vm1441_vm2  ;;  %v1069_v54 = vunpack.c.l.s4 %v4123_v53  ;;  %s4997_s0 = sld [smem:[#allocation36_spill]]  ;;  %s4998_s2 = sld [smem:[#allocation37_spill]] }
 0x138   : > { %vm1445_vm7 = vmand %vm1443_vm3, %vm1444_vm4  ;;  %v1458_v29 = vld [vmem:[#allocation3] sm:$0x11]  ;;  %v1455_v31 = vld [vmem:[#allocation2 + $0x10] sm:$0x11]  ;;  %v903_v42 = vunpack.c.0.s8 %v902_v40  ;;  %s5000_s16 = sld [smem:[#allocation39_spill]]  ;;  %s679_s22 = scalar_lea.vmem [#allocation21], %s3089_s7 }
 0x139   : > { %vm4616_vm9 = vmor %vm1445_vm7, %vm1442_vm5  ;;  %v1461_v33 = vld [vmem:[#allocation3 + $0x10] sm:$0x11]  ;;  %v1467_v34 = vld [vmem:[#allocation4 + $0x10] sm:$0x11]  ;;  %vm2166_vm7 = vcmask 1046528   ;;  %s3263_s27 = sshll.u32 %s4236_s28, 8 }
 0x13a   : > { %3323 = vmatpush3.bf16.msra.mxu0 %v3635_v6  ;;  %3343 = vmatpush3.bf16.msra.mxu1 %v3636_v7  ;;  %vm1451_vm10 = vmand %vm1047_vm1, %vm1450_vm6  ;;  %v1459_v32 = vsel %vm4616_vm9, 0, %v1458_v29  ;;  %v3098_v44 = vld [vmem:[%s4923_s3] ss:$0 sm:$0xff]  ;;  %v906_v46 = vsub.s32 %v903_v42, %v905_v43  ;;  %v1070_v6 = vunpack.c.0.s8 %v1069_v54  ;;  %s5001_s21 = sld [smem:[#allocation40_spill]]  ;;  %s2897_s7 = scalar_lea.sflag [#allocation8], %s4545_s15 }
 0x13b   : > { %3324 = vmatprep.subr.bf16.mxu0 %v4119_v1  ;;  %3344 = vmatprep.subr.bf16.mxu1 %v4119_v1  ;;  %vm1453_vm11 = vmand %vm1443_vm3, %vm1452_vm8  ;;  %1460 = vst [vmem:[#allocation3] sm:$0x11] %v1459_v32  ;;  %p5002_p10 = scmp.ne.s32.totalorder %s4972_s20, 0  ;;  %s4125_s28 = smov [#allocation21]  }
 0x13c   : > { %vm1454_vm13 = vmor %vm1453_vm11, %vm1451_vm10  ;;  %s4022_s6 = sshll.u32 %s4125_s28, 4  ;;  %s4023_s6 = int_to_ptr.vmem [resolvable:$false] %s4022_s6 }
 0x13d   : > { %v1456_v35 = vsel %vm1454_vm13, 0, %v1455_v31  ;;  %v1462_v36 = vsel %vm1454_vm13, 0, %v1461_v33  ;;  %v1468_v37 = vsel %vm1454_vm13, 0, %v1467_v34  ;;  %vm1510_vm15 = vmand %vm1509_vm12, %vm1450_vm6  ;;  %s4024_s29 = scalar_lea.vmem %s4023_s6, 512 }
 0x13e   : > { %3325 = vmatpush3.bf16.msra.mxu0 %v3637_v8  ;;  %3345 = vmatpush3.bf16.msra.mxu1 %v3638_v9  ;;  %1457 = vst [vmem:[#allocation2 + $0x10] sm:$0x11] %v1456_v35  ;;  %1463 = vst [vmem:[#allocation3 + $0x10] sm:$0x11] %v1462_v36  ;;  %v1073_v36 = vsub.s32 %v1070_v6, %v905_v43  ;;  %v3655_v43 = vld [vmem:[#allocation14] sm:$0xff]   ;;  %v1332_v6 = vld [vmem:[#allocation15 + $0x38] sm:$0xff] }
 0x13f   : > { %3326 = vmatprep.subr.bf16.mxu0 %v4119_v1  ;;  %3346 = vmatprep.subr.bf16.mxu1 %v4119_v1  ;;  %1469 = vst [vmem:[#allocation4 + $0x10] sm:$0x11] %v1468_v37  ;;  %vm1512_vm4 = vmand %vm1511_vm14, %vm1452_vm8  ;;  %vm1855_vm8 = vsmask.f32 7424 }
 0x140   : > { %vm4629_vm5 = vmor %vm1512_vm4, %vm1510_vm15  ;;  %s4875_s8 = scalar_lea.hbm %s5001_s21, %s3263_s27 }
 0x141   : > { %vm4682_vm6 = vmor %vm1511_vm14, %vm1509_vm12 }
 0x142   : > { %3327 = vmatpush3.bf16.msra.mxu0 %v3639_v10  ;;  %3347 = vmatpush3.bf16.msra.mxu1 %v3640_v11 }
 0x143   : > { %3328 = vmatprep.subr.bf16.mxu0 %v4119_v1  ;;  %3348 = vmatprep.subr.bf16.mxu1 %v4119_v1 }
 0x146   : > { %3329 = vmatpush3.bf16.msra.mxu0 %v3641_v12  ;;  %3349 = vmatpush3.bf16.msra.mxu1 %v3642_v13 }
 0x147   : > { %3330 = vmatprep.subr.bf16.mxu0 %v4119_v1  ;;  %3350 = vmatprep.subr.bf16.mxu1 %v4119_v1 }
 0x14a   : > { %3331 = vmatpush3.bf16.msra.mxu0 %v3643_v14  ;;  %3351 = vmatpush3.bf16.msra.mxu1 %v3644_v15 }
 0x14b   : > { %3332 = vmatprep.subr.bf16.mxu0 %v4119_v1  ;;  %3352 = vmatprep.subr.bf16.mxu1 %v4119_v1 }
 0x14e   : > { %3333 = vmatpush3.bf16.msra.mxu0 %v3645_v16  ;;  %3353 = vmatpush3.bf16.msra.mxu1 %v3646_v18 }
 0x14f   : > { %3358 = vmatprep.subr.bf16.mxu0 %v4119_v1 }
 0x151   : > { %3335 = vmatmul.mubr.bf16.vlgmr.msra.gmra.mrb[0].mxu0 %v682_v20  ;;  %3355 = vmatmul.mubr.bf16.vlgmr.msra.gmra.mrb[0].mxu1 %v682_v20 }
 0x152   : > { %3359 = vmatpush3.bf16.msra.mxu0 %v3647_v19  ;;  %3374 = vmatprep.mubr.msk.bf16.mxu0 %vm4120_vm0, %v4119_v1 }
 0x153   : > { %3360 = vmatprep.subr.bf16.mxu0 %v4119_v1 }
 0x156   : > { %3361 = vmatpush3.bf16.msra.mxu0 %v3648_v21 }
 0x157   : > { %3362 = vmatprep.subr.bf16.mxu0 %v4119_v1 }
 0x15a   : > { %3363 = vmatpush3.bf16.msra.mxu0 %v3649_v22 }
 0x15b   : > { %3364 = vmatprep.subr.bf16.mxu0 %v4119_v1 }
 0x15e   : > { %3365 = vmatpush3.bf16.msra.mxu0 %v3650_v23 }
 0x15f   : > { %3366 = vmatprep.subr.bf16.mxu0 %v4119_v1 }
 0x162   : > { %3367 = vmatpush3.bf16.msra.mxu0 %v3651_v24 }
 0x163   : > { %3368 = vmatprep.subr.bf16.mxu0 %v4119_v1 }
 0x166   : > { %3369 = vmatpush3.bf16.msra.mxu0 %v3652_v25 }
 0x167   : > { %3370 = vmatprep.subr.bf16.mxu0 %v4119_v1 }
 0x16a   : > { %3371 = vmatpush3.bf16.msra.mxu0 %v3653_v26 }
 0x16b   : > { %3372 = vmatprep.subr.bf16.mxu0 %v4119_v1 }
 0x16e   : > { %3373 = vmatpush3.bf16.msra.mxu0 %v3654_v27 }
 0x16f   : > { %3378 = vmatprep.subr.bf16.mxu0 %v4119_v1 }
 0x224   : > { %v788_v45 = vpop.f32.mrb[0].mxu0  ;;  %v893_v48 = vpop.f32.mrb[0].mxu1 }
 0x225   : > { %v789_v47 = vadd.f32 %v3098_v44, %v788_v45  ;;  %v3336_v49 = vpop.f32.mrb[1].mxu0  ;;  %v894_v50 = vadd.f32 %v3098_v44, %v893_v48  ;;  %v3356_v51 = vpop.f32.mrb[1].mxu1 }
 0x226   : > { %v791_v52 = vpop.f32.mrb[2].mxu0  ;;  %v896_v57 = vpop.f32.mrb[2].mxu1 }
 0x227   : > { %v900_v55 = vcombine.high %v789_v47, %v789_v47  ;;  %v907_v56 = vrot.slane %v789_v47, %v906_v46  ;;  %v3337_v58 = vpop.f32.mrb[3].mxu0  ;;  %v958_v59 = vcombine.high %v894_v50, %v894_v50  ;;  %v965_v60 = vrot.slane %v894_v50, %v906_v46  ;;  %v3357_v61 = vpop.f32.mrb[3].mxu1  ;;  %v1325_v57 = vld [vmem:[#allocation15] sm:$0xff] }
 0x228   : > { %v1326_v58 = vld [vmem:[#allocation15 + $0x8] sm:$0xff] }
 0x229   : > { %v914_v62 = vrot.slane %v900_v55, %v906_v46  ;;  %v915_v63 = vcombine.high %v907_v56, %v907_v56  ;;  %v923_v0 = vrot.slane %v907_v56, %v906_v46  ;;  %v972_v3 = vrot.slane %v958_v59, %v906_v46  ;;  %v3656_v55 = vld [vmem:[#allocation14 + $0x8] sm:$0xff]   ;;  %v3657_v56 = vld [vmem:[#allocation14 + $0x10] sm:$0xff]  }
 0x22a   : > { %v973_v4 = vcombine.high %v965_v60, %v965_v60  ;;  %v981_v5 = vrot.slane %v965_v60, %v906_v46  ;;  %v1327_v59 = vld [vmem:[#allocation15 + $0x10] sm:$0xff]  ;;  %v3658_v60 = vld [vmem:[#allocation14 + $0x18] sm:$0xff]   ;;  %v3433_v61 = vpack.c.bf16 %v1326_v58, %v1325_v57 }
 0x22b   : > { %v916_v7 = vcombine.high %v914_v62, %v914_v62  ;;  %v930_v8 = vrot.slane %v914_v62, %v906_v46  ;;  %v937_v9 = vrot.slane %v915_v63, %v906_v46  ;;  %v945_v10 = vcombine.high %v923_v0, %v923_v0  ;;  %v1328_v62 = vld [vmem:[#allocation15 + $0x18] sm:$0xff] }
 0x22c   : > { %v974_v11 = vcombine.high %v972_v3, %v972_v3  ;;  %v988_v12 = vrot.slane %v972_v3, %v906_v46  ;;  %v995_v13 = vrot.slane %v973_v4, %v906_v46  ;;  %v1003_v14 = vcombine.high %v981_v5, %v981_v5  ;;  %3434 = vmatprep.subr.bf16.mxu1 %v3433_v61  ;;  %v3659_v3 = vld [vmem:[#allocation14 + $0x20] sm:$0xff]  }
 0x22d   : > { %v944_v15 = vrot.slane %v916_v7, %v906_v46  ;;  %v946_v16 = vcombine.high %v930_v8, %v930_v8  ;;  %v947_v17 = vcombine.high %v937_v9, %v937_v9  ;;  %v1010_v18 = vrot.slane %v981_v5, %v1009_v2  ;;  %3436 = vmatpush3.bf16.msra.mxu1 %v3433_v61  ;;  %v1331_v5 = vld [vmem:[#allocation15 + $0x30] sm:$0xff]  ;;  %v3660_v7 = vld [vmem:[#allocation14 + $0x28] sm:$0xff]  }
 0x22e   : > { %v1002_v19 = vrot.slane %v974_v11, %v906_v46  ;;  %v1004_v20 = vcombine.high %v988_v12, %v988_v12  ;;  %v1005_v21 = vcombine.high %v995_v13, %v995_v13  ;;  %v1014_v22 = vrot.slane %v995_v13, %v1009_v2  ;;  %v3661_v11 = vld [vmem:[#allocation14 + $0x30] sm:$0xff]  }
 0x22f   : > { %v948_v23 = vcombine.high %v944_v15, %v944_v15  ;;  %v1018_v24 = vrot.slane %v1003_v14, %v1009_v2  ;;  %v1026_v25 = vrot.slane %v988_v12, %v1009_v2  ;;  %v1048_v26 = vsel %vm1047_vm1, %v923_v0, %v1010_v18  ;;  %v1329_v0 = vld [vmem:[#allocation15 + $0x20] sm:$0xff]  ;;  %v1335_v13 = vld [vmem:[#allocation15 + $0x50] sm:$0xff]  ;;  %v1336_v14 = vld [vmem:[#allocation15 + $0x58] sm:$0xff] }
 0x230   : > { %v1006_v27 = vcombine.high %v1002_v19, %v1002_v19  ;;  %v1022_v29 = vrot.slane %v1005_v21, %v1009_v2  ;;  %v1030_v31 = vrot.slane %v1002_v19, %v1009_v2  ;;  %v1034_v32 = vrot.slane %v1004_v20, %v1009_v2  ;;  %v1337_v19 = vld [vmem:[#allocation15 + $0x60] sm:$0xff]  ;;  %v1338_v20 = vld [vmem:[#allocation15 + $0x68] sm:$0xff] }
 0x231   : > { %v1049_v33 = vsel %vm1047_vm1, %v937_v9, %v1014_v22  ;;  %v1050_v34 = vsel %vm1047_vm1, %v945_v10, %v1018_v24  ;;  %v1052_v35 = vsel %vm1047_vm1, %v930_v8, %v1026_v25  ;;  %v3437_v63 = vpack.c.bf16 %v1328_v62, %v1327_v59  ;;  %v1333_v9 = vld [vmem:[#allocation15 + $0x40] sm:$0xff]  ;;  %v1334_v10 = vld [vmem:[#allocation15 + $0x48] sm:$0xff]  ;;  %v3663_v22 = vld [vmem:[#allocation18] sm:$0xff]  }
 0x232   : > { %v1038_v37 = vrot.slane %v1006_v27, %v1009_v2  ;;  %v1051_v39 = vsel %vm1047_vm1, %v947_v17, %v1022_v29  ;;  %v1053_v40 = vsel %vm1047_vm1, %v944_v15, %v1030_v31  ;;  %v1054_v41 = vsel %vm1047_vm1, %v946_v16, %v1034_v32  ;;  %v1330_v2 = vld [vmem:[#allocation15 + $0x28] sm:$0xff]  ;;  %v3662_v15 = vld [vmem:[#allocation14 + $0x38] sm:$0xff]   ;;  %v4654_v16 = vld [vmem:[%s4559_s17] sm:$0xff] }
 0x233   : > { %v1066_v42 = vcombine.low %v1048_v26, %v1049_v33  ;;  %v1067_v44 = vcombine.low %v1050_v34, %v1051_v39  ;;  %v1083_v45 = vcombine.low %v1052_v35, %v1053_v40  ;;  %3438 = vmatprep.subr.bf16.mxu1 %v3437_v63  ;;  %v3441_v4 = vpack.c.bf16 %v1330_v2, %v1329_v0  ;;  %v4657_v17 = vld [vmem:[%s4559_s17 + $0x8] sm:$0xff]  ;;  %v3664_v24 = vld [vmem:[#allocation18 + $0x8] sm:$0xff]   ;;  %v3666_v25 = vld [vmem:[#allocation18 + $0x18] sm:$0xff]   ;;  %s4999_s17 = sld [smem:[#allocation38_spill]] }
 0x234   : > { %v1055_v46 = vsel %vm1047_vm1, %v948_v23, %v1038_v37  ;;  %3440 = vmatpush3.bf16.msra.mxu1 %v3437_v63  ;;  %v3445_v8 = vpack.c.bf16 %v1332_v6, %v1331_v5  ;;  %v3449_v12 = vpack.c.bf16 %v1334_v10, %v1333_v9  ;;  %v3453_v18 = vpack.c.bf16 %v1336_v14, %v1335_v13  ;;  %v3667_v26 = vld [vmem:[#allocation18 + $0x20] sm:$0xff]   ;;  %v3668_v27 = vld [vmem:[#allocation18 + $0x28] sm:$0xff]   ;;  %v3669_v29 = vld [vmem:[#allocation18 + $0x30] sm:$0xff]  }
 0x235   : > { %v1074_v47 = vrot.slane %v1066_v42, %v1073_v36  ;;  %v1081_v48 = vrot.slane %v1067_v44, %v1073_v36  ;;  %v1084_v49 = vcombine.low %v1054_v41, %v1055_v46  ;;  %v1091_v51 = vrot.slane %v1083_v45, %v1073_v36  ;;  %3442 = vmatprep.subr.bf16.mxu1 %v3441_v4  ;;  %v3670_v31 = vld [vmem:[#allocation18 + $0x38] sm:$0xff]   ;;  %v3671_v32 = vld [vmem:[#allocation18 + $0x40] sm:$0xff]  }
 0x236   : > { %v1215_v21 = vpack.c.bf16 %v4657_v17, %v4654_v16  ;;  %v3457_v23 = vpack.c.bf16 %v1338_v20, %v1337_v19  ;;  %v1339_v39 = vld [vmem:[#allocation15 + $0x70] sm:$0xff]  ;;  %v1340_v40 = vld [vmem:[#allocation15 + $0x78] sm:$0xff]  ;;  %vm1487_vm1 = vsmask.f32 4368 }
 0x237   : > { %v1082_v50 = vcombine.low %v1074_v47, %v1081_v48  ;;  %v1098_v52 = vrot.slane %v1084_v49, %v1073_v36  ;;  %v3461_v41 = vpack.c.bf16 %v1340_v40, %v1339_v39  ;;  %vm4675_vm3 = vmor %vm1441_vm2, %vm1487_vm1  ;;  %vm1668_vm2 = vcmask 130048  }
 0x238   : > { %3444 = vmatpush3.bf16.msra.mxu1 %v3441_v4 }
 0x239   : > { %v1099_v53 = vcombine.low %v1091_v51, %v1098_v52  ;;  %3446 = vmatprep.subr.bf16.mxu1 %v3445_v8  ;;  %v1562_v51 = vld [vmem:[#allocation3 + $0x10] sm:$0x11] }
 0x23b   : > { %v1102_v54 = vpack.c.bf16 %v1099_v53, %v1082_v50  ;;  %v1558_v50 = vld [vmem:[#allocation3] sm:$0xff] }
 0x23c   : > { %3448 = vmatpush3.bf16.msra.mxu1 %v3445_v8 }
 0x23d   : > { %1525 = vrot.lane.b32.xlu1 %v1102_v54, %s4124_s5  ;;  %3375 = vmatmul.mubr.bf16.vlgmr.msra.gmra.mrb[4].mxu0 %v1102_v54 }
 0x23e   : > { %3379 = vmatpush3.bf16.msra.mxu0 %v3655_v43  ;;  %3394 = vmatprep.mubr.msk.bf16.mxu0 %vm4120_vm0, %v4119_v1  ;;  %vm1474_vm0 = vcmask 64512  }
 0x23f   : > { %3380 = vmatprep.subr.bf16.mxu0 %v4119_v1  ;;  %3450 = vmatprep.subr.bf16.mxu1 %v3449_v12 }
 0x240   : > { %3452 = vmatpush3.bf16.msra.mxu1 %v3449_v12  ;;  %v3115_v12 = vld [vmem:[%s4996_s18] ss:$0 sm:$0xff]  ;;  %s2910_s18 = sshll.u32 %s679_s22, 4  ;;  %s4870_s18 = int_to_ptr.vmem [resolvable:$true] %s2910_s18 }
 0x241   : > { %3454 = vmatprep.subr.bf16.mxu1 %v3453_v18  ;;  %p4025_p4 = scmp.lt.s32.totalorder %s4870_s18, %s4023_s6 }
 0x242   : > { %3381 = vmatpush3.bf16.msra.mxu0 %v3656_v55 }
 0x243   : > { %3382 = vmatprep.subr.bf16.mxu0 %v4119_v1 }
 0x244   : > { %3456 = vmatpush3.bf16.msra.mxu1 %v3453_v18 }
 0x245   : > { %3458 = vmatprep.subr.bf16.mxu1 %v3457_v23 }
 0x246   : > { %3383 = vmatpush3.bf16.msra.mxu0 %v3657_v56  ;;  %v3132_v56 = vld [vmem:[#allocation5] ss:$0 sm:$0xff] }
 0x247   : > { %3384 = vmatprep.subr.bf16.mxu0 %v4119_v1  ;;  %1348 = vperm.xlu0 %3630, %v3132_v56  }
 0x248   : > { %3460 = vmatpush3.bf16.msra.mxu1 %v3457_v23 }
 0x249   : > { %3462 = vmatprep.subr.bf16.mxu1 %v3461_v41 }
 0x24a   : > { %3385 = vmatpush3.bf16.msra.mxu0 %v3658_v60 }
 0x24b   : > { %3386 = vmatprep.subr.bf16.mxu0 %v4119_v1 }
 0x24c   : > { %3464 = vmatpush3.bf16.msra.mxu1 %v3461_v41 }
 0x24d   : > { %1779 = vmatprep.subr.bf16.mxu1 %v4121_v28 }
 0x24e   : > { %3387 = vmatpush3.bf16.msra.mxu0 %v3659_v3 }
 0x24f   : > { %3388 = vmatprep.subr.bf16.mxu0 %v4119_v1 }
 0x252   : > { %3389 = vmatpush3.bf16.msra.mxu0 %v3660_v7 }
 0x253   : > { %3390 = vmatprep.subr.bf16.mxu0 %v4119_v1 }
 0x256   : > { %3391 = vmatpush3.bf16.msra.mxu0 %v3661_v11 }
 0x257   : > { %3392 = vmatprep.subr.bf16.mxu0 %v4119_v1  ;;  %v3665_v1 = vld [vmem:[#allocation18 + $0x10] sm:$0xff]  }
 0x25a   : > { %3393 = vmatpush3.bf16.msra.mxu0 %v3662_v15 }
 0x25b   : > { %1672 = vmatprep.subr.bf16.mxu0 %v4121_v28 }
 0x25d   : > { %3395 = vmatmul.mubr.bf16.vlgmr.msra.gmra.mrb[4].mxu0 %v1215_v21 }
 0x25e   : > { %1673 = vmatpush1.bf16.msra.mxu0 %v3663_v22 }
 0x25f   : > { %1674 = vmatprep.subr.bf16.mxu0 %v4121_v28 }
 0x262   : > { %1675 = vmatpush1.bf16.msra.mxu0 %v3664_v24 }
 0x263   : > { %1676 = vmatprep.subr.bf16.mxu0 %v4121_v28 }
 0x266   : > { %1677 = vmatpush1.bf16.msra.mxu0 %v3665_v1 }
 0x267   : > { %1678 = vmatprep.subr.bf16.mxu0 %v4121_v28 }
 0x26a   : > { %1679 = vmatpush1.bf16.msra.mxu0 %v3666_v25 }
 0x26b   : > { %1680 = vmatprep.subr.bf16.mxu0 %v4121_v28 }
 0x26e   : > { %1681 = vmatpush1.bf16.msra.mxu0 %v3667_v26  ;;  %v3672_v26 = vld [vmem:[#allocation17] sm:$0xff]  }
 0x26f   : > { %1682 = vmatprep.subr.bf16.mxu0 %v4121_v28 }
 0x272   : > { %1683 = vmatpush1.bf16.msra.mxu0 %v3668_v27  ;;  %v1447_v27 = vld [vmem:[#allocation2] sm:$0x11] }
 0x273   : > { %1684 = vmatprep.subr.bf16.mxu0 %v4121_v28 }
 0x276   : > { %1685 = vmatpush1.bf16.msra.mxu0 %v3669_v29  ;;  %v3673_v29 = vld [vmem:[#allocation17 + $0x8] sm:$0xff]  }
 0x277   : > { %1686 = vmatprep.subr.bf16.mxu0 %v4121_v28 }
 0x27a   : > { %1687 = vmatpush1.bf16.msra.mxu0 %v3670_v31  ;;  %v1448_v31 = vsel %vm4616_vm9, 0, %v1447_v27  ;;  %v3681_v27 = vld [vmem:[#allocation17 + $0x48] sm:$0xff]  }
 0x27b   : > { %1688 = vmatprep.subr.bf16.mxu0 %v4121_v28  ;;  %1449 = vst [vmem:[#allocation2] sm:$0x11] %v1448_v31 }
 0x27e   : > { %1689 = vmatpush1.bf16.msra.mxu0 %v3671_v32  ;;  %v3674_v32 = vld [vmem:[#allocation17 + $0x10] sm:$0xff]  }
 0x27f   : > { %2603 = vmatprep.subr.bf16.mxu0 %v4121_v28 }
 0x2af   : > { %v1526_v33 = vpop.permute.xlu1 %1525 }
 0x2b0   : > { %v1528_v34 = vsel %vm1474_vm0, 0, %v1526_v33  ;;  %v1529_v35 = vsel %vm1474_vm0, %v1526_v33, 0  ;;  %v3675_v33 = vld [vmem:[#allocation17 + $0x18] sm:$0xff]  }
 0x2b1   : > { %v3137_v36 = vcombine.low %v1528_v34, %v1529_v35  ;;  %v3138_v37 = vcombine.high %v1528_v34, %v1529_v35 }
 0x2b3   : > { %v1539_v42 = vshrl.u32 %v3137_v36, 16  ;;  %v1547_v44 = vshrl.u32 %v3138_v37, 16  ;;  %v1542_v46 = vshll.u32 %v3137_v36, 16  ;;  %v1550_v48 = vshll.u32 %v3138_v37, 16 }
 0x2b5   : > { %v1541_v45 = vrot.slane %v1539_v42, 7  ;;  %v1549_v47 = vrot.slane %v1547_v44, 7 }
 0x2b7   : > { %v1544_v53 = vor.u32 %v1542_v46, %v1541_v45  ;;  %v1545_v43 = vrot.slane %v1541_v45, 4  ;;  %v1552_v54 = vor.u32 %v1550_v48, %v1549_v47  ;;  %v1554_v55 = vrot.slane %v1549_v47, 4  ;;  %v3676_v47 = vld [vmem:[#allocation17 + $0x20] sm:$0xff]   ;;  %v3677_v48 = vld [vmem:[#allocation17 + $0x28] sm:$0xff]  }
 0x2b9   : > { %v1553_v57 = vsel %vm4675_vm3, %v1545_v43, %v1552_v54  ;;  %v1559_v58 = vsel %vm4629_vm5, %v1544_v53, %v1558_v50  ;;  %v1563_v59 = vsel %vm4616_vm9, %v1554_v55, %v1562_v51  ;;  %v3678_v43 = vld [vmem:[#allocation17 + $0x30] sm:$0xff]   ;;  %v3679_v55 = vld [vmem:[#allocation17 + $0x38] sm:$0xff]  }
 0x2ba   : > { %1560 = vst [vmem:[#allocation3] sm:$0xff] %v1559_v58  ;;  %1561 = vst.msk [vmem:[#allocation3 + $0x8] sm:$0xff] %vm4682_vm6, %v1553_v57  ;;  %v3680_v57 = vld [vmem:[#allocation17 + $0x40] sm:$0xff]  }
 0x2bb   : > { %1564 = vst [vmem:[#allocation3 + $0x10] sm:$0x11] %v1563_v59 }
 0x2c1   : > { %v1586_v60 = vld [vmem:[#allocation3 + $0x8] sm:$0xff]  ;;  %v2274_v62 = vld [vmem:[#allocation3] sm:$0xee] }
 0x2c2   : > { %v1983_v61 = vld [vmem:[#allocation3 + $0x10] sm:$0x11]  ;;  %v4694_v63 = vcombine.high %v1559_v58, %v1586_v60  ;;  %v4696_v0 = vcombine.low %v1559_v58, %v1586_v60  ;;  %v3204_v4 = vcombine.high %v2274_v62, %v1586_v60  ;;  %v3203_v5 = vcombine.low %v2274_v62, %v1586_v60 }
 0x2c3   : > { %v4698_v2 = vcombine.high %v1983_v61, %v1983_v61  ;;  %v4700_v3 = vcombine.low %v1983_v61, %v1983_v61 }
 0x2c4   : > { %3150 = vmatprep.mubr.msk.bf16.mxu0 %vm1668_vm2, %v4694_v63  ;;  %v2302_v6 = vrot.slane %v3204_v4, 1  ;;  %v2299_v8 = vrot.slane %v3203_v5, 1 }
 0x2c5   : > { %1705 = vmatmul.mubr.bf16.vlgmr.msra.gmra.mrb[8].mxu0 %v4696_v0  ;;  %v2303_v7 = vrot.slane %v4698_v2, 1  ;;  %v2300_v9 = vrot.slane %v4700_v3, 1 }
 0x2c6   : > { %v1349_v34 = vpop.permute.xlu0 %1348 }
 0x2c7   : > { %v4708_v10 = vsel %vm2166_vm7, %v2302_v6, %v2303_v7  ;;  %v4711_v11 = vsel %vm2166_vm7, %v2299_v8, %v2300_v9  ;;  %v1514_v8 = vld [vmem:[#allocation2] sm:$0xff]  ;;  %v1521_v9 = vld [vmem:[#allocation2 + $0x10] sm:$0x11] }
 0x330   : > { %v1314_v13 = vpop.f32.mrb[4].mxu0 }
 0x331   : > { %v3465_v14 = vadd.f32 %v3115_v12, %v1314_v13  ;;  %v3396_v15 = vpop.f32.mrb[5].mxu0 }
 0x332   : > { %v1317_v18 = vpop.f32.mrb[6].mxu0 }
 0x333   : > { %v1323_v19 = vmax.f32 %v3465_v14, 0.0  ;;  %v3466_v20 = vadd.f32 %v3115_v12, %v1317_v18  ;;  %v3397_v21 = vpop.f32.mrb[7].mxu0 }
 0x335   : > { %v1324_v22 = vmax.f32 %v3466_v20, 0.0  ;;  %3430 = vmatprep.mubr.f32.mxu1 %v1323_v19 }
 0x337   : > { %3431 = vmatmul.mubr.f32.vlgmr.msra.gmra.mrb[4].mxu1 %v1324_v22 }
 0x338   : > { %1780 = vmatpush1.bf16.msra.mxu1 %v3672_v26 }
 0x339   : > { %1781 = vmatprep.subr.bf16.mxu1 %v4121_v28 }
 0x33c   : > { %1782 = vmatpush1.bf16.msra.mxu1 %v3673_v29 }
 0x33d   : > { %1783 = vmatprep.subr.bf16.mxu1 %v4121_v28 }
 0x340   : > { %1784 = vmatpush1.bf16.msra.mxu1 %v3674_v32 }
 0x341   : > { %1785 = vmatprep.subr.bf16.mxu1 %v4121_v28 }
 0x344   : > { %1786 = vmatpush1.bf16.msra.mxu1 %v3675_v33 }
 0x345   : > { %1787 = vmatprep.subr.bf16.mxu1 %v4121_v28 }
 0x348   : > { %1788 = vmatpush1.bf16.msra.mxu1 %v3676_v47 }
 0x349   : > { %1789 = vmatprep.subr.bf16.mxu1 %v4121_v28 }
 0x34c   : > { %1790 = vmatpush1.bf16.msra.mxu1 %v3677_v48 }
 0x34d   : > { %1791 = vmatprep.subr.bf16.mxu1 %v4121_v28 }
 0x350   : > { %1792 = vmatpush1.bf16.msra.mxu1 %v3678_v43  ;;  %v3686_v43 = vld [vmem:[#allocation17 + $0x68] sm:$0xff]  }
 0x351   : > { %1793 = vmatprep.subr.bf16.mxu1 %v4121_v28 }
 0x354   : > { %1794 = vmatpush1.bf16.msra.mxu1 %v3679_v55  ;;  %v3688_v55 = vld [vmem:[#allocation17 + $0x78] sm:$0xff]  }
 0x355   : > { %1795 = vmatprep.subr.bf16.mxu1 %v4121_v28 }
 0x358   : > { %1796 = vmatpush1.bf16.msra.mxu1 %v3680_v57  ;;  %v2031_v57 = vshll.u32 %v4694_v63, 16 }
 0x359   : > { %1938 = vmatprep.subr.bf16.mxu1 %v4121_v28 }
 0x398   : > { %v4716_v23 = vpop.f32.mrb[8].mxu0 }
 0x399   : > { %v1708_v24 = vpop.f32.mrb[9].mxu0 }
 0x39a   : > { %v4718_v1 = vpop.f32.mrb[10].mxu0 }
 0x39b   : > { %v1711_v25 = vpop.f32.mrb[11].mxu0 }
 0x40a   : > { %v3432_v35 = vpop.f32.mrb[4].mxu1 }
 0x40b   : > { %v1423_v36 = vadd.f32 %v3432_v35, %v1349_v34  ;;  %v1417_v37 = vpop.f32.mrb[5].mxu1 }
 0x40c   : > { %v1418_v39 = vadd.f32 %v1417_v37, %v1349_v34 }
 0x40d   : > { %v3134_v40 = vmul.f32 -1.442695, %v1423_v36 }
 0x40e   : > { %v3133_v41 = vmul.f32 -1.442695, %v1418_v39  ;;  %v3682_v39 = vld [vmem:[#allocation17 + $0x50] sm:$0xff]  }
 0x40f   : > { %3754 = vpow2.f32 %v3134_v40 }
 0x410   : > { %3756 = vpow2.f32 %v3133_v41 }
 0x419   : > { %v3755_v42 = vpop.eup %3754 }
 0x41a   : > { %v3757_v44 = vpop.eup %3756  ;;  %v1433_v45 = vadd.f32 1.0, %v3755_v42 }
 0x41b   : > { %v1432_v46 = vadd.f32 1.0, %v3757_v44 }
 0x41c   : > { %3758 = vrcp.f32 %v1433_v45 }
 0x41d   : > { %3760 = vrcp.f32 %v1432_v46 }
 0x426   : > { %v3759_v50 = vpop.eup %3758 }
 0x427   : > { %v3761_v51 = vpop.eup %3760  ;;  %v1439_v53 = vmul.f32 %v3759_v50, %v4657_v17 }
 0x428   : > { %v1438_v54 = vmul.f32 %v3761_v51, %v4654_v16  ;;  %v3684_v51 = vld [vmem:[#allocation17 + $0x58] sm:$0xff]  }
 0x42a   : > { %v1470_v56 = vpack.c.bf16 %v1439_v53, %v1438_v54  ;;  %v3685_v53 = vld [vmem:[#allocation17 + $0x60] sm:$0xff]   ;;  %v3687_v54 = vld [vmem:[#allocation17 + $0x70] sm:$0xff]  }
 0x42c   : > { %1472 = vrot.lane.b32.xlu0 %v1470_v56, %s4124_s5 }
 0x49e   : > { %v1473_v58 = vpop.permute.xlu0 %1472 }
 0x49f   : > { %v1477_v17 = vsel %vm1474_vm0, 0, %v1473_v58  ;;  %v1478_v59 = vsel %vm1474_vm0, %v1473_v58, 0  ;;  %v3689_v58 = vld [vmem:[#allocation17 + $0x80] sm:$0xff]  }
 0x4a0   : > { %v3135_v16 = vcombine.low %v1477_v17, %v1478_v59  ;;  %v3136_v60 = vcombine.high %v1477_v17, %v1478_v59  ;;  %v2033_v59 = vrot.slane %v2031_v57, 1 }
 0x4a2   : > { %v1490_v61 = vshrl.u32 %v3135_v16, 16  ;;  %v1498_v62 = vshrl.u32 %v3136_v60, 16  ;;  %v1493_v5 = vshll.u32 %v3135_v16, 16  ;;  %v1501_v7 = vshll.u32 %v3136_v60, 16  ;;  %v3690_v16 = vld [vmem:[#allocation17 + $0x88] sm:$0xff]  }
 0x4a4   : > { %v1492_v4 = vrot.slane %v1490_v61, 7  ;;  %v1500_v6 = vrot.slane %v1498_v62, 7  ;;  %v2029_v62 = vshrl.u32 %v4694_v63, 16  ;;  %v3695_v63 = vld [vmem:[#allocation18 + $0x58] sm:$0xff]  }
 0x4a6   : > { %v1495_v12 = vor.u32 %v1493_v5, %v1492_v4  ;;  %v1496_v13 = vrot.slane %v1492_v4, 4  ;;  %v1503_v14 = vor.u32 %v1501_v7, %v1500_v6  ;;  %v1505_v15 = vrot.slane %v1500_v6, 4 }
 0x4a7   : > { %v2036_v4 = vshll.u32 %v4698_v2, 16  ;;  %v2034_v6 = vor.u32 %v2033_v59, %v2029_v62  ;;  %v3696_v2 = vld [vmem:[#allocation18 + $0x60] sm:$0xff]  }
 0x4a8   : > { %v1504_v18 = vsel %vm4675_vm3, %v1496_v13, %v1503_v14  ;;  %v1515_v19 = vsel %vm4629_vm5, %v1495_v12, %v1514_v8  ;;  %v1522_v20 = vsel %vm4616_vm9, %v1505_v15, %v1521_v9  ;;  %v3692_v8 = vld [vmem:[#allocation18 + $0x48] sm:$0xff]   ;;  %v3694_v14 = vld [vmem:[#allocation18 + $0x50] sm:$0xff]  }
 0x4a9   : > { %1516 = vst [vmem:[#allocation2] sm:$0xff] %v1515_v19  ;;  %1520 = vst.msk [vmem:[#allocation2 + $0x8] sm:$0xff] %vm4682_vm6, %v1504_v18  ;;  %v2038_v9 = vrot.slane %v2036_v4, 1  ;;  %v3697_v15 = vld [vmem:[#allocation18 + $0x68] sm:$0xff]   ;;  %v3698_v18 = vld [vmem:[#allocation18 + $0x70] sm:$0xff]  }
 0x4aa   : > { %1523 = vst [vmem:[#allocation2 + $0x10] sm:$0x11] %v1522_v20  ;;  %v2019_v20 = vshll.u32 %v4696_v0, 16 }
 0x4ab   : > { %v2039_v13 = vsel %vm1855_vm8, %v2034_v6, %v2038_v9 }
 0x4b0   : > { %v1566_v21 = vld [vmem:[#allocation2 + $0x8] sm:$0xff]  ;;  %v2141_v24 = vld [vmem:[#allocation2] sm:$0xee] }
 0x4b1   : > { %v1822_v22 = vld [vmem:[#allocation2 + $0x10] sm:$0x11]  ;;  %v3152_v25 = vcombine.high %v1515_v19, %v1566_v21  ;;  %v3151_v26 = vcombine.low %v1515_v19, %v1566_v21  ;;  %v3192_v32 = vcombine.high %v2141_v24, %v1566_v21  ;;  %v3191_v33 = vcombine.low %v2141_v24, %v1566_v21  ;;  %v3701_v24 = vld [vmem:[#allocation18 + $0x88] sm:$0xff]  }
 0x4b2   : > { %v3166_v29 = vcombine.high %v1822_v22, %v1822_v22  ;;  %v3165_v31 = vcombine.low %v1822_v22, %v1822_v22  ;;  %v3699_v19 = vld [vmem:[#allocation18 + $0x78] sm:$0xff]   ;;  %v3700_v21 = vld [vmem:[#allocation18 + $0x80] sm:$0xff]   ;;  %v2021_v22 = vrot.slane %v2019_v20, 1 }
 0x4b3   : > { %3162 = vmatprep.mubr.msk.bf16.mxu1 %vm1668_vm2, %v3152_v25  ;;  %v1871_v34 = vshll.u32 %v3152_v25, 16  ;;  %v2170_v36 = vrot.slane %v3192_v32, 1  ;;  %v1869_v40 = vshrl.u32 %v3152_v25, 16  ;;  %v2167_v42 = vrot.slane %v3191_v33, 1  ;;  %v3705_v33 = vld [vmem:[#allocation17 + $0x98] sm:$0xff]  }
 0x4b4   : > { %v1876_v35 = vshll.u32 %v3166_v29, 16  ;;  %1812 = vmatmul.mubr.bf16.vlgmr.msra.gmra.mrb[8].mxu1 %v3151_v26  ;;  %v2171_v37 = vrot.slane %v3166_v29, 1  ;;  %v2168_v44 = vrot.slane %v3165_v31, 1  ;;  %v1859_v56 = vshll.u32 %v3151_v26, 16 }
 0x4b5   : > { %1939 = vmatpush1.bf16.msra.mxu1 %v3681_v27  ;;  %v1873_v41 = vrot.slane %v1871_v34, 1  ;;  %v1857_v60 = vshrl.u32 %v3151_v26, 16  ;;  %v1864_v61 = vshll.u32 %v3165_v31, 16  ;;  %v2017_v25 = vshrl.u32 %v4696_v0, 16  ;;  %v3703_v31 = vld [vmem:[#allocation17 + $0x90] sm:$0xff]   ;;  %v3706_v0 = vld [vmem:[#allocation17 + $0xa0] sm:$0xff]  }
 0x4b6   : > { %1940 = vmatprep.subr.bf16.mxu1 %v4121_v28  ;;  %v4747_v45 = vsel %vm2166_vm7, %v2170_v36, %v2171_v37  ;;  %v1878_v47 = vrot.slane %v1876_v35, 1  ;;  %v4750_v48 = vsel %vm2166_vm7, %v2167_v42, %v2168_v44  ;;  %v1861_v17 = vrot.slane %v1859_v56, 1  ;;  %v3708_v34 = vld [vmem:[#allocation17 + $0xb0] sm:$0xff]   ;;  %v3709_v35 = vld [vmem:[#allocation17 + $0xb8] sm:$0xff]   ;;  %v3710_v36 = vld [vmem:[#allocation17 + $0xc0] sm:$0xff]  }
 0x4b7   : > { %v1874_v46 = vor.u32 %v1873_v41, %v1869_v40  ;;  %v1866_v7 = vrot.slane %v1864_v61, 1  ;;  %v2024_v26 = vshll.u32 %v4700_v3, 16  ;;  %v2022_v27 = vor.u32 %v2021_v22, %v2017_v25  ;;  %v3707_v3 = vld [vmem:[#allocation17 + $0xa8] sm:$0xff]   ;;  %v3715_v41 = vld [vmem:[#allocation18 + $0x98] sm:$0xff]   ;;  %v3716_v42 = vld [vmem:[#allocation18 + $0xa0] sm:$0xff]  }
 0x4b8   : > { %v1862_v5 = vor.u32 %v1861_v17, %v1857_v60  ;;  %v3711_v37 = vld [vmem:[#allocation17 + $0xc8] sm:$0xff]   ;;  %v3717_v44 = vld [vmem:[#allocation18 + $0xa8] sm:$0xff]   ;;  %v3726_v61 = vld [vmem:[#allocation20 + $0x60] sm:$0xff]  }
 0x4b9   : > { %1941 = vmatpush1.bf16.msra.mxu1 %v3682_v39  ;;  %v1879_v50 = vsel %vm1855_vm8, %v1874_v46, %v1878_v47  ;;  %v2026_v29 = vrot.slane %v2024_v26, 1  ;;  %v3712_v39 = vld [vmem:[#allocation17 + $0xd0] sm:$0xff]   ;;  %v3714_v40 = vld [vmem:[#allocation18 + $0x90] sm:$0xff]   ;;  %v3721_v47 = vld [vmem:[#allocation18 + $0xc8] sm:$0xff]  }
 0x4ba   : > { %3176 = vmatprep.mubr.msk.bf16.mxu1 %vm1668_vm2, %v1879_v50  ;;  %1942 = vmatprep.subr.bf16.mxu1 %v4121_v28  ;;  %v1867_v12 = vsel %vm1855_vm8, %v1862_v5, %v1866_v7  ;;  %v3719_v46 = vld [vmem:[#allocation18 + $0xb8] sm:$0xff]   ;;  %v3723_v50 = vld [vmem:[#allocation20 + $0x48] sm:$0xff]   ;;  %v3215_v56 = vld [vmem:[%s4997_s0] ss:$0 sm:$0xff] }
 0x4bb   : > { %v2027_v32 = vsel %vm1855_vm8, %v2022_v27, %v2026_v29  ;;  %2604 = vmatpush1.bf16.msra.mxu0 %v3723_v50  ;;  %v3727_v5 = vld [vmem:[#allocation20 + $0x68] sm:$0xff]   ;;  %v2465_v27 = vld [vmem:[#allocation4 + $0x10] sm:$0x11] }
 0x4bc   : > { %2605 = vmatprep.subr.bf16.mxu0 %v4121_v28 }
 0x4bd   : > { %1943 = vmatpush1.bf16.msra.mxu1 %v3684_v51  ;;  %v1464_v51 = vld [vmem:[#allocation4] sm:$0x11] }
 0x4be   : > { %1944 = vmatprep.subr.bf16.mxu1 %v4121_v28 }
 0x4c1   : > { %1945 = vmatpush1.bf16.msra.mxu1 %v3685_v53  ;;  %v1465_v53 = vsel %vm4616_vm9, 0, %v1464_v51 }
 0x4c2   : > { %1946 = vmatprep.subr.bf16.mxu1 %v4121_v28  ;;  %1466 = vst [vmem:[#allocation4] sm:$0x11] %v1465_v53 }
 0x4c5   : > { %1947 = vmatpush1.bf16.msra.mxu1 %v3686_v43  ;;  %v3724_v43 = vld [vmem:[#allocation20 + $0x50] sm:$0xff]  }
 0x4c6   : > { %1948 = vmatprep.subr.bf16.mxu1 %v4121_v28  ;;  %2606 = vmatpush1.bf16.msra.mxu0 %v3724_v43 }
 0x4c7   : > { %2607 = vmatprep.subr.bf16.mxu0 %v4121_v28 }
 0x4c9   : > { %1949 = vmatpush1.bf16.msra.mxu1 %v3687_v54  ;;  %v3725_v54 = vld [vmem:[#allocation20 + $0x58] sm:$0xff]   ;;  %v2461_v26 = vld [vmem:[#allocation4] sm:$0xff] }
 0x4ca   : > { %1950 = vmatprep.subr.bf16.mxu1 %v4121_v28  ;;  %2608 = vmatpush1.bf16.msra.mxu0 %v3725_v54 }
 0x4cb   : > { %2609 = vmatprep.subr.bf16.mxu0 %v4121_v28 }
 0x4cd   : > { %1951 = vmatpush1.bf16.msra.mxu1 %v3688_v55 }
 0x4ce   : > { %1952 = vmatprep.subr.bf16.mxu1 %v4121_v28  ;;  %2610 = vmatpush1.bf16.msra.mxu0 %v3726_v61  ;;  %v3740_v61 = vld [vmem:[#allocation20 + $0x30] sm:$0xff]  }
 0x4cf   : > { %2611 = vmatprep.subr.bf16.mxu0 %v4121_v28 }
 0x4d1   : > { %1953 = vmatpush1.bf16.msra.mxu1 %v3689_v58  ;;  %v3216_v58 = vld [vmem:[%s4998_s2] ss:$0 sm:$0xff]  ;;  %s4018_s2 = scalar_lea.vmem %s4870_s18, 256 }
 0x4d2   : > { %1954 = vmatprep.subr.bf16.mxu1 %v4121_v28  ;;  %2612 = vmatpush1.bf16.msra.mxu0 %v3727_v5  ;;  %p4019_p6 = scmp.ne.s32.totalorder %s4870_s18, %s4018_s2  ;;  %p4026_p8 = scmp.lt.s32.totalorder %s4024_s29, %s4018_s2 }
 0x4d3   : > { %2613 = vmatprep.subr.bf16.mxu0 %v4121_v28 }
 0x4d4   : > { %p4020_p5 = pnand %p4019_p6, %p5002_p10  ;;  %p4027_p11 = por %p4026_p8, %p4025_p4 }
 0x4d5   : > { %1955 = vmatpush1.bf16.msra.mxu1 %v3690_v16 }
 0x4d6   : > { %2098 = vmatprep.subr.bf16.mxu1 %v4121_v28  ;;  %p4021_p9 = pneg %p4020_p5 }
 0x4d8   : > { %1971 = vmatmul.mubr.bf16.vlgmr.msra.gmra.mrb[8].mxu1 %v1867_v12  ;;  %v3730_v12 = vld [vmem:[#allocation20 + $0x80] sm:$0xff]   ;;  %p4028_p3 = pnand %p4027_p11, %p4021_p9 }
 0x4d9   : > { %2099 = vmatpush1.bf16.msra.mxu1 %v3692_v8  ;;  %3190 = vmatprep.mubr.msk.bf16.mxu1 %vm1668_vm2, %v2039_v13  ;;  %v3728_v8 = vld [vmem:[#allocation20 + $0x70] sm:$0xff]   ;;  %v3731_v13 = vld [vmem:[#allocation20 + $0x88] sm:$0xff]  }
 0x4da   : > { %2100 = vmatprep.subr.bf16.mxu1 %v4121_v28  ;;  %2614 = vmatpush1.bf16.msra.mxu0 %v3728_v8 }
 0x4db   : > { %2615 = vmatprep.subr.bf16.mxu0 %v4121_v28 }
 0x4dd   : > { %2101 = vmatpush1.bf16.msra.mxu1 %v3694_v14 }
 0x4de   : > { %2102 = vmatprep.subr.bf16.mxu1 %v4121_v28 }
 0x4e1   : > { %2103 = vmatpush1.bf16.msra.mxu1 %v3695_v63 }
 0x4e2   : > { %2104 = vmatprep.subr.bf16.mxu1 %v4121_v28 }
 0x4e5   : > { %2105 = vmatpush1.bf16.msra.mxu1 %v3696_v2 }
 0x4e6   : > { %2106 = vmatprep.subr.bf16.mxu1 %v4121_v28 }
 0x4e9   : > { %2107 = vmatpush1.bf16.msra.mxu1 %v3697_v15 }
 0x4ea   : > { %2108 = vmatprep.subr.bf16.mxu1 %v4121_v28 }
 0x4ed   : > { %2109 = vmatpush1.bf16.msra.mxu1 %v3698_v18 }
 0x4ee   : > { %2110 = vmatprep.subr.bf16.mxu1 %v4121_v28 }
 0x4f1   : > { %2111 = vmatpush1.bf16.msra.mxu1 %v3699_v19 }
 0x4f2   : > { %2112 = vmatprep.subr.bf16.mxu1 %v4121_v28 }
 0x4f5   : > { %2113 = vmatpush1.bf16.msra.mxu1 %v3700_v21 }
 0x4f6   : > { %2114 = vmatprep.subr.bf16.mxu1 %v4121_v28 }
 0x4f9   : > { %2115 = vmatpush1.bf16.msra.mxu1 %v3701_v24 }
 0x4fa   : > { %2231 = vmatprep.subr.bf16.mxu1 %v4121_v28 }
 0x4fc   : > { %2131 = vmatmul.mubr.bf16.vlgmr.msra.gmra.mrb[8].mxu1 %v2027_v32 }
 0x4fd   : > { %2232 = vmatpush1.bf16.msra.mxu1 %v3703_v31  ;;  %3202 = vmatprep.mubr.msk.bf16.mxu1 %vm1668_vm2, %v4747_v45  ;;  %v3718_v45 = vld [vmem:[#allocation18 + $0xb0] sm:$0xff]  }
 0x4fe   : > { %2233 = vmatprep.subr.bf16.mxu1 %v4121_v28 }
 0x501   : > { %2234 = vmatpush1.bf16.msra.mxu1 %v3705_v33 }
 0x502   : > { %2235 = vmatprep.subr.bf16.mxu1 %v4121_v28 }
 0x505   : > { %2236 = vmatpush1.bf16.msra.mxu1 %v3706_v0 }
 0x506   : > { %2237 = vmatprep.subr.bf16.mxu1 %v4121_v28 }
 0x509   : > { %2238 = vmatpush1.bf16.msra.mxu1 %v3707_v3 }
 0x50a   : > { %2239 = vmatprep.subr.bf16.mxu1 %v4121_v28 }
 0x50d   : > { %2240 = vmatpush1.bf16.msra.mxu1 %v3708_v34 }
 0x50e   : > { %2241 = vmatprep.subr.bf16.mxu1 %v4121_v28 }
 0x511   : > { %2242 = vmatpush1.bf16.msra.mxu1 %v3709_v35 }
 0x512   : > { %2243 = vmatprep.subr.bf16.mxu1 %v4121_v28 }
 0x515   : > { %2244 = vmatpush1.bf16.msra.mxu1 %v3710_v36 }
 0x516   : > { %2245 = vmatprep.subr.bf16.mxu1 %v4121_v28 }
 0x519   : > { %2246 = vmatpush1.bf16.msra.mxu1 %v3711_v37 }
 0x51a   : > { %2247 = vmatprep.subr.bf16.mxu1 %v4121_v28 }
 0x51d   : > { %2248 = vmatpush1.bf16.msra.mxu1 %v3712_v39 }
 0x51e   : > { %2363 = vmatprep.subr.bf16.mxu1 %v4121_v28 }
 0x520   : > { %2264 = vmatmul.mubr.bf16.vlgmr.msra.gmra.mrb[8].mxu1 %v4750_v48  ;;  %v3722_v48 = vld [vmem:[#allocation18 + $0xd0] sm:$0xff]  }
 0x521   : > { %2364 = vmatpush1.bf16.msra.mxu1 %v3714_v40  ;;  %3214 = vmatprep.mubr.msk.bf16.mxu1 %vm1668_vm2, %v4708_v10  ;;  %v3720_v10 = vld [vmem:[#allocation18 + $0xc0] sm:$0xff]  }
 0x522   : > { %2365 = vmatprep.subr.bf16.mxu1 %v4121_v28 }
 0x525   : > { %2366 = vmatpush1.bf16.msra.mxu1 %v3715_v41 }
 0x526   : > { %2367 = vmatprep.subr.bf16.mxu1 %v4121_v28 }
 0x529   : > { %2368 = vmatpush1.bf16.msra.mxu1 %v3716_v42 }
 0x52a   : > { %2369 = vmatprep.subr.bf16.mxu1 %v4121_v28 }
 0x52d   : > { %2370 = vmatpush1.bf16.msra.mxu1 %v3717_v44 }
 0x52e   : > { %2371 = vmatprep.subr.bf16.mxu1 %v4121_v28 }
 0x531   : > { %2372 = vmatpush1.bf16.msra.mxu1 %v3718_v45 }
 0x532   : > { %2373 = vmatprep.subr.bf16.mxu1 %v4121_v28 }
 0x535   : > { %2374 = vmatpush1.bf16.msra.mxu1 %v3719_v46 }
 0x536   : > { %2375 = vmatprep.subr.bf16.mxu1 %v4121_v28 }
 0x539   : > { %2376 = vmatpush1.bf16.msra.mxu1 %v3720_v10 }
 0x53a   : > { %2377 = vmatprep.subr.bf16.mxu1 %v4121_v28 }
 0x53d   : > { %2378 = vmatpush1.bf16.msra.mxu1 %v3721_v47 }
 0x53e   : > { %2379 = vmatprep.subr.bf16.mxu1 %v4121_v28 }
 0x541   : > { %2380 = vmatpush1.bf16.msra.mxu1 %v3722_v48 }
 0x544   : > { %2396 = vmatmul.mubr.bf16.vlgmr.msra.gmra.mrb[8].mxu1 %v4711_v11 }
 0x617   : > { %v2397_v55 = vpop.f32.mrb[8].mxu1 }
 0x618   : > { %v3467_v11 = vadd.f32 %v2397_v55, %v4716_v23  ;;  %v2399_v57 = vpop.f32.mrb[9].mxu1 }
 0x619   : > { %v2400_v17 = vpop.f32.mrb[10].mxu1 }
 0x61a   : > { %v2413_v59 = vmul.f32 %v3467_v11, %v3215_v56  ;;  %v3468_v16 = vadd.f32 %v2400_v17, %v4718_v1  ;;  %v2402_v60 = vpop.f32.mrb[11].mxu1  ;;  %v3729_v1 = vld [vmem:[#allocation20 + $0x78] sm:$0xff]   ;;  %v3736_v17 = vld [vmem:[#allocation20 + $0x10] sm:$0xff]  }
 0x61b   : > { %2616 = vmatpush1.bf16.msra.mxu0 %v3729_v1  ;;  %v3739_v60 = vld [vmem:[#allocation20 + $0x28] sm:$0xff]   ;;  %v3746_v1 = vld [vmem:[#allocation20 + $0xa0] sm:$0xff]  }
 0x61c   : > { %v2422_v62 = vadd.f32 %v3216_v58, %v2413_v59  ;;  %v2414_v4 = vmul.f32 %v3468_v16, %v3215_v56  ;;  %2617 = vmatprep.subr.bf16.mxu0 %v4121_v28  ;;  %v3734_v56 = vld [vmem:[#allocation20] sm:$0xff]   ;;  %v3737_v59 = vld [vmem:[#allocation20 + $0x18] sm:$0xff]  }
 0x61d   : > { %v3738_v16 = vld [vmem:[#allocation20 + $0x20] sm:$0xff]  }
 0x61e   : > { %v2423_v23 = vadd.f32 %v3216_v58, %v2414_v4  ;;  %v2424_v6 = vmax.f32 %v2422_v62, 0.0  ;;  %v3735_v58 = vld [vmem:[#allocation20 + $0x8] sm:$0xff]   ;;  %v3741_v62 = vld [vmem:[#allocation20 + $0x38] sm:$0xff]  }
 0x61f   : > { %2618 = vmatpush1.bf16.msra.mxu0 %v3730_v12  ;;  %v3747_v12 = vld [vmem:[#allocation20 + $0xa8] sm:$0xff]  }
 0x620   : > { %v2425_v7 = vmax.f32 %v2423_v23, 0.0  ;;  %2619 = vmatprep.subr.bf16.mxu0 %v4121_v28  ;;  %v3742_v23 = vld [vmem:[#allocation20 + $0x40] sm:$0xff]  }
 0x622   : > { %v2426_v9 = vpack.c.bf16 %v2425_v7, %v2424_v6  ;;  %v3743_v7 = vld [vmem:[#allocation20 + $0x90] sm:$0xff]  }
 0x623   : > { %2620 = vmatpush1.bf16.msra.mxu0 %v3731_v13  ;;  %v3748_v13 = vld [vmem:[#allocation20 + $0xb0] sm:$0xff]  }
 0x624   : > { %2428 = vrot.lane.b32.xlu1 %v2426_v9, %s4124_s5  ;;  %2701 = vmatprep.subr.bf16.mxu0 %v4121_v28  ;;  %v3745_v9 = vld [vmem:[#allocation20 + $0x98] sm:$0xff]  }
 0x696   : > { %v2429_v14 = vpop.permute.xlu1 %2428 }
 0x697   : > { %v2431_v63 = vsel %vm1474_vm0, 0, %v2429_v14  ;;  %v2432_v2 = vsel %vm1474_vm0, %v2429_v14, 0  ;;  %v3749_v14 = vld [vmem:[#allocation20 + $0xb8] sm:$0xff]  }
 0x698   : > { %v3217_v15 = vcombine.low %v2431_v63, %v2432_v2  ;;  %v3218_v18 = vcombine.high %v2431_v63, %v2432_v2  ;;  %v3750_v63 = vld [vmem:[#allocation20 + $0xc0] sm:$0xff]   ;;  %v3751_v2 = vld [vmem:[#allocation20 + $0xc8] sm:$0xff]  }
 0x69a   : > { %v2442_v19 = vshrl.u32 %v3217_v15, 16  ;;  %v2450_v20 = vshrl.u32 %v3218_v18, 16  ;;  %v2445_v22 = vshll.u32 %v3217_v15, 16  ;;  %v2453_v25 = vshll.u32 %v3218_v18, 16  ;;  %v3752_v15 = vld [vmem:[#allocation20 + $0xd0] sm:$0xff]  }
 0x69b   : > { %v3255_v18 = vld [vmem:[%s4999_s17] ss:$0 sm:$0xff] }
 0x69c   : > { %v2444_v21 = vrot.slane %v2442_v19, 7  ;;  %v2452_v24 = vrot.slane %v2450_v20, 7  ;;  %v3256_v20 = vld [vmem:[%s5000_s16] ss:$0 sm:$0xff] }
 0x69e   : > { %v2447_v29 = vor.u32 %v2445_v22, %v2444_v21  ;;  %v2448_v31 = vrot.slane %v2444_v21, 4  ;;  %v2455_v32 = vor.u32 %v2453_v25, %v2452_v24  ;;  %v2457_v33 = vrot.slane %v2452_v24, 4 }
 0x6a0   : > { %v2456_v0 = vsel %vm4675_vm3, %v2448_v31, %v2455_v32  ;;  %v2462_v3 = vsel %vm4629_vm5, %v2447_v29, %v2461_v26  ;;  %v2466_v34 = vsel %vm4616_vm9, %v2457_v33, %v2465_v27 }
 0x6a1   : > { %2463 = vst [vmem:[#allocation4] sm:$0xff] %v2462_v3  ;;  %2464 = vst.msk [vmem:[#allocation4 + $0x8] sm:$0xff] %vm4682_vm6, %v2456_v0 }
 0x6a2   : > { %2467 = vst [vmem:[#allocation4 + $0x10] sm:$0x11] %v2466_v34 }
 0x6a8   : > { %v2469_v35 = vld [vmem:[#allocation4 + $0x8] sm:$0xff]  ;;  %v2742_v37 = vld [vmem:[#allocation4] sm:$0xee] }
 0x6a9   : > { %v2488_v36 = vld [vmem:[#allocation4 + $0x10] sm:$0x11]  ;;  %v3220_v39 = vcombine.high %v2462_v3, %v2469_v35  ;;  %v3219_v41 = vcombine.low %v2462_v3, %v2469_v35  ;;  %v3243_v49 = vcombine.low %v2742_v37, %v2469_v35  ;;  %v3244_v4 = vcombine.high %v2742_v37, %v2469_v35 }
 0x6aa   : > { %v3222_v40 = vcombine.high %v2488_v36, %v2488_v36  ;;  %v3221_v42 = vcombine.low %v2488_v36, %v2488_v36 }
 0x6ab   : > { %v2536_v44 = vshll.u32 %v3220_v39, 16  ;;  %v2524_v38 = vshll.u32 %v3219_v41, 16  ;;  %v2534_v10 = vshrl.u32 %v3220_v39, 16  ;;  %v2767_v47 = vrot.slane %v3243_v49, 1 }
 0x6ac   : > { %v2541_v45 = vshll.u32 %v3222_v40, 16  ;;  %v2529_v46 = vshll.u32 %v3221_v42, 16  ;;  %v2768_v48 = vrot.slane %v3221_v42, 1  ;;  %v2522_v50 = vshrl.u32 %v3219_v41, 16 }
 0x6ad   : > { %v2538_v30 = vrot.slane %v2536_v44, 1  ;;  %v2526_v52 = vrot.slane %v2524_v38, 1  ;;  %v2770_v5 = vrot.slane %v3244_v4, 1  ;;  %v2771_v6 = vrot.slane %v3222_v40, 1 }
 0x6ae   : > { %v2543_v53 = vrot.slane %v2541_v45, 1  ;;  %v4835_v43 = vsel %vm2166_vm7, %v2767_v47, %v2768_v48  ;;  %v2531_v55 = vrot.slane %v2529_v46, 1 }
 0x6af   : > { %v2539_v51 = vor.u32 %v2538_v30, %v2534_v10  ;;  %v2527_v54 = vor.u32 %v2526_v52, %v2522_v50  ;;  %v2772_v8 = vsel %vm2166_vm7, %v2770_v5, %v2771_v6 }
 0x6b1   : > { %v2544_v11 = vsel %vm1855_vm8, %v2539_v51, %v2543_v53  ;;  %v2532_v57 = vsel %vm1855_vm8, %v2527_v54, %v2531_v55 }
 0x6b2   : > { %3232 = vmatprep.mubr.msk.bf16.mxu0 %vm1668_vm2, %v2544_v11 }
 0x6b3   : > { %2636 = vmatmul.mubr.bf16.vlgmr.msra.gmra.mrb[12].mxu0 %v2532_v57 }
 0x6b4   : > { %2702 = vmatpush1.bf16.msra.mxu0 %v3734_v56  ;;  %3242 = vmatprep.mubr.msk.bf16.mxu0 %vm1668_vm2, %v3220_v39 }
 0x6b5   : > { %2703 = vmatprep.subr.bf16.mxu0 %v4121_v28 }
 0x6b8   : > { %2704 = vmatpush1.bf16.msra.mxu0 %v3735_v58 }
 0x6b9   : > { %2705 = vmatprep.subr.bf16.mxu0 %v4121_v28 }
 0x6bc   : > { %2706 = vmatpush1.bf16.msra.mxu0 %v3736_v17 }
 0x6bd   : > { %2707 = vmatprep.subr.bf16.mxu0 %v4121_v28 }
 0x6c0   : > { %2708 = vmatpush1.bf16.msra.mxu0 %v3737_v59 }
 0x6c1   : > { %2709 = vmatprep.subr.bf16.mxu0 %v4121_v28 }
 0x6c4   : > { %2710 = vmatpush1.bf16.msra.mxu0 %v3738_v16 }
 0x6c5   : > { %2711 = vmatprep.subr.bf16.mxu0 %v4121_v28 }
 0x6c8   : > { %2712 = vmatpush1.bf16.msra.mxu0 %v3739_v60 }
 0x6c9   : > { %2713 = vmatprep.subr.bf16.mxu0 %v4121_v28 }
 0x6cc   : > { %2714 = vmatpush1.bf16.msra.mxu0 %v3740_v61 }
 0x6cd   : > { %2715 = vmatprep.subr.bf16.mxu0 %v4121_v28 }
 0x6d0   : > { %2716 = vmatpush1.bf16.msra.mxu0 %v3741_v62 }
 0x6d1   : > { %2717 = vmatprep.subr.bf16.mxu0 %v4121_v28 }
 0x6d4   : > { %2718 = vmatpush1.bf16.msra.mxu0 %v3742_v23 }
 0x6d5   : > { %2831 = vmatprep.subr.bf16.mxu0 %v4121_v28 }
 0x6d7   : > { %2734 = vmatmul.mubr.bf16.vlgmr.msra.gmra.mrb[12].mxu0 %v3219_v41 }
 0x6d8   : > { %2832 = vmatpush1.bf16.msra.mxu0 %v3743_v7  ;;  %3254 = vmatprep.mubr.msk.bf16.mxu0 %vm1668_vm2, %v2772_v8 }
 0x6d9   : > { %2833 = vmatprep.subr.bf16.mxu0 %v4121_v28 }
 0x6dc   : > { %2834 = vmatpush1.bf16.msra.mxu0 %v3745_v9 }
 0x6dd   : > { %2835 = vmatprep.subr.bf16.mxu0 %v4121_v28 }
 0x6e0   : > { %2836 = vmatpush1.bf16.msra.mxu0 %v3746_v1 }
 0x6e1   : > { %2837 = vmatprep.subr.bf16.mxu0 %v4121_v28 }
 0x6e4   : > { %2838 = vmatpush1.bf16.msra.mxu0 %v3747_v12 }
 0x6e5   : > { %2839 = vmatprep.subr.bf16.mxu0 %v4121_v28 }
 0x6e8   : > { %2840 = vmatpush1.bf16.msra.mxu0 %v3748_v13 }
 0x6e9   : > { %2841 = vmatprep.subr.bf16.mxu0 %v4121_v28 }
 0x6ec   : > { %2842 = vmatpush1.bf16.msra.mxu0 %v3749_v14 }
 0x6ed   : > { %2843 = vmatprep.subr.bf16.mxu0 %v4121_v28 }
 0x6f0   : > { %2844 = vmatpush1.bf16.msra.mxu0 %v3750_v63 }
 0x6f1   : > { %2845 = vmatprep.subr.bf16.mxu0 %v4121_v28 }
 0x6f4   : > { %2846 = vmatpush1.bf16.msra.mxu0 %v3751_v2 }
 0x6f5   : > { %2847 = vmatprep.subr.bf16.mxu0 %v4121_v28 }
 0x6f8   : > { %2848 = vmatpush1.bf16.msra.mxu0 %v3752_v15 }
 0x6fb   : > { %2864 = vmatmul.mubr.bf16.vlgmr.msra.gmra.mrb[12].mxu0 %v4835_v43 }
 0x7ce   : > { %v2865_v19 = vpop.f32.mrb[12].mxu0 }
 0x7cf   : > { %v2881_v21 = vmul.f32 %v3255_v18, %v2865_v19  ;;  %v2867_v22 = vpop.f32.mrb[13].mxu0 }
 0x7d0   : > { %v2868_v24 = vpop.f32.mrb[14].mxu0 }
 0x7d1   : > { %v2890_v25 = vadd.f32 %v3256_v20, %v2881_v21  ;;  %v2882_v28 = vmul.f32 %v3255_v18, %v2868_v24  ;;  %v2870_v26 = vpop.f32.mrb[15].mxu0 }
 0x7d3   : > { %v2892_v27 = vmax.f32 %v2890_v25, 0.0  ;;  %v2891_v29 = vadd.f32 %v3256_v20, %v2882_v28 }
 0x7d5   : > { %2894 = vst [vmem:[%s679_s22] sm:$0xff] %v2892_v27  ;;  %v2893_v31 = vmax.f32 %v2891_v29, 0.0 }
 0x7d7   : > { %2895 = vst [vmem:[%s679_s22 + $0x8] sm:$0xff] %v2893_v31 }
 0x7d8   : > { %4031 = shalt.err (!%p4028_p3)
}
 0x7d9   : > { %s4032_s17 = scalar_lea.hbm %s4875_s8, 256  ;;  %s4036_s16 = scalar_lea.hbm %s5001_s21, 512 }
 0x7da   : > { %p4033_p12 = scmp.ne.s32.totalorder %s4875_s8, %s4032_s17  ;;  %p4037_p0 = scmp.lt.u32.totalorder %s4875_s8, %s5001_s21 }
 0x7db   : > { %p4038_p7 = scmp.lt.u32.totalorder %s4036_s16, %s4032_s17  ;;  %p4040_p6 = scmp.lt.u32.totalorder %s4032_s17, %s4875_s8 }
 0x7dc   : > { %p4034_p1 = pnand %p4033_p12, %p5002_p10 }
 0x7dd   : > { %p4039_p2 = por %p4038_p7, %p4037_p0 }
 0x7de   : > { %p4035_p13 = pneg %p4034_p1 }
 0x7df   : > { %p4041_p5 = por %p4040_p6, %p4039_p2 }
 0x7e1   : > { %p4042_p9 = pnand %p4041_p5, %p4035_p13 }
 0x7e3   : > { %4045 = shalt.err (!%p4042_p9)
}
 0x7e4   : > { %s4126_s9 = smov 128  }
 0x7e5   : > { %3529 = dma.vmem_to_hbm [thread:$0]  (%p5002_p10), %s4870_s18, 256, %s4875_s8, %s2897_s7, %s4126_s9, %s4126_s9, %s4124_s5  }
 0x7e6 PF: > { %s2925_s0 = sand.u32 1, %s4092_s23   ;;  %p5003_p4 = scmp.ne.s32.totalorder %s4973_s14, 0 }
 0x7e7   : > { %p5004_p8 = scmp.ge.s32.totalorder %s4104_s26, 2  ;;  %s2926_s2 = scalar_lea.sflag [#allocation8], %s2925_s0 }
 0x7e9   : > { %p3561_p11 = pnand %p5004_p8, %p5003_p4 }
 0x7eb   : > { %4087 = dma.done.wait (!%p3561_p11), %s2926_s2, 256  }
 0x7ec   : > { %4089 = vsyncadd (!%p3561_p11), %s2926_s2, 4294967040  ;;  %p37_p3 = scmp.ge.s32.totalorder %s4430_s30, 4   ;;  %s5005_s23 = smov %s4096_s24 }
 0x7ed   : > { %s5006_s24 = smov %s4100_s25  ;;  %s5007_s25 = smov %s4442_s4 }
 0x7ee   : > { %s5008_s26 = smov %s4430_s30  ;;  %39 = sbr.rel (!%p37_p3) target bundleno = 23 (0x17), region = 177 }
 0x7f5   :  { %2931 = vsyncpa [#allocation7], 1 }
 0x7f6   :  { %2933 = vsyncpa [#allocation7 + $0x1], 1 }
 0x7f7   :  { %2934 = vsyncpa [#allocation10], 1 }
 0x7f8   :  { %2936 = vsyncpa [#allocation10 + $0x1], 1 }
 0x7f9   :  { %2937 = vsyncpa [#allocation13], 1 }
 0x7fa   :  { %2938 = vsyncpa [#allocation16], 1 }
 0x7fb   :  { %2939 = vsyncpa [#allocation19], 1 }
 0x7fc   :  { %2940 = vsyncpa [#allocation8], 1 }
 0x7fd   :  { %2942 = vsyncpa [#allocation8 + $0x1], 1 }

</bundles_post_ra>
